<compile_context>
chip_gen: v7x
topology: tpu7x:2x2x1
jax: 0.10.0
libtpu: 0.0.40
codegen_flags: <defaults>
</compile_context>

<pallas_src>
import jax
import jax.numpy as jnp
from jax.experimental import pallas as pl
from jax.experimental.pallas import tpu as pltpu

LANE = 128      # vreg lane width  (last dim granularity)
SUBLANE = 8     # vreg sublane count (second-to-last dim granularity)


def _round_up(n, m):
    return ((n + m - 1) // m) * m


def _pick_tile(dim, preferred, granule):
    """Largest tile <= preferred that divides `dim` and is a multiple of
    `granule`.  Requires dim % granule == 0 (guaranteed by our padding), so it
    can never fall back to an arbitrarily large (VMEM-busting) block."""
    assert dim % granule == 0, (dim, granule)
    if dim <= preferred:
        return dim
    t = (preferred // granule) * granule
    while t > granule and dim % t != 0:
        t -= granule
    return t


# --------------------------- tiled GEMM (+bias) kernel -----------------------

def _matmul_bias_kernel(x_ref, w_ref, b_ref, o_ref, acc_ref):
    k = pl.program_id(2)

    @pl.when(k == 0)
    def _():
        acc_ref[...] = jnp.zeros_like(acc_ref)

    # bf16 operands into the MXU, f32 accumulation.
    acc_ref[...] += jnp.dot(x_ref[...].astype(jnp.bfloat16), w_ref[...],
                            preferred_element_type=jnp.float32)

    @pl.when(k == pl.num_programs(2) - 1)
    def _():
        o_ref[...] = (acc_ref[...] + b_ref[...]).astype(o_ref.dtype)


def matmul_bias(x, w, b, *, out_dtype=jnp.float32, tm=512, tn=512, tk=512):
    """x: (M, K) @ w: (K, N) + b: (N,) -> (M, N).  w is bf16; f32 accumulate."""
    M, K = x.shape
    K2, N = w.shape
    assert K == K2 and b.shape == (N,)
    assert M % SUBLANE == 0 and N % LANE == 0 and K % LANE == 0
    tm = _pick_tile(M, tm, SUBLANE)
    tn = _pick_tile(N, tn, LANE)
    tk = _pick_tile(K, tk, LANE)
    return pl.pallas_call(
        _matmul_bias_kernel,
        out_shape=jax.ShapeDtypeStruct((M, N), out_dtype),
        grid_spec=pltpu.PrefetchScalarGridSpec(
            num_scalar_prefetch=0,
            grid=(M // tm, N // tn, K // tk),
            in_specs=[
                pl.BlockSpec((tm, tk), lambda i, j, k: (i, k)),
                pl.BlockSpec((tk, tn), lambda i, j, k: (k, j)),
                pl.BlockSpec((1, tn), lambda i, j, k: (0, j)),
            ],
            out_specs=pl.BlockSpec((tm, tn), lambda i, j, k: (i, j)),
            scratch_shapes=[pltpu.VMEM((tm, tn), jnp.float32)],
        ),
        compiler_params=pltpu.CompilerParams(
            dimension_semantics=("parallel", "parallel", "arbitrary")),
    )(x, w, b.reshape(1, N))


# ----------------------------- LSTM recurrence kernel ------------------------

def _fast_sigmoid(x):
    # 1 EUP op (tanh) + cheap VPU mul/add instead of exp + divide (2 EUP ops).
    return 0.5 * (jnp.tanh(0.5 * x) + 1.0)


def _lstm_recurrent_kernel(xg_ref, whh_hbm_ref, hseq_ref,
                           whh_scr, dma_sem, h_scr, c_scr):
    # grid = (batch_blocks, time_chunks); time is innermost and sequential.
    @pl.when(pl.program_id(1) == 0)
    def _():
        # Grid-invariant recurrent weight: DMA it once per batch block into
        # VMEM scratch (no wasted second auto-pipeline buffer).
        cp = pltpu.make_async_copy(whh_hbm_ref, whh_scr, dma_sem)
        cp.start()
        cp.wait()
        h_scr[...] = jnp.zeros_like(h_scr)
        c_scr[...] = jnp.zeros_like(c_scr)

    TS = xg_ref.shape[0]
    Hp = h_scr.shape[-1]
    whh = whh_scr[...]                       # bf16, loaded once per chunk

    def step(s, carry):
        h, c = carry                         # f32, register/vreg resident
        # Only the recurrent matmul is on the serial path; the input
        # projection (incl. bias) was precomputed for the whole sequence.
        gates = xg_ref[s].astype(jnp.float32) + jnp.dot(
            h.astype(jnp.bfloat16), whh, preferred_element_type=jnp.float32)
        i = _fast_sigmoid(gates[:, 0 * Hp:1 * Hp])   # lane-aligned gate slots
        f = _fast_sigmoid(gates[:, 1 * Hp:2 * Hp])
        g = jnp.tanh(gates[:, 2 * Hp:3 * Hp])
        o = _fast_sigmoid(gates[:, 3 * Hp:4 * Hp])
        c = f * c + i * g
        h = o * jnp.tanh(c)
        hseq_ref[s] = h.astype(hseq_ref.dtype)
        return h, c

    h, c = jax.lax.fori_loop(0, TS, step, (h_scr[...], c_scr[...]),
                             unroll=min(8, TS))
    # Flush state to VMEM scratch once per chunk, not per timestep.
    h_scr[...] = h
    c_scr[...] = c


def _pick_time_chunk(T, bb, Hp, whh_bytes, budget_bytes, max_chunk=32):
    """Largest TS (<= max_chunk) whose VMEM working set fits budget_bytes."""
    # double-buffered bf16 x_gates block + double-buffered bf16 hseq block
    per_ts = 2 * bb * 4 * Hp * 2 + 2 * bb * Hp * 2
    fixed = whh_bytes + 2 * bb * Hp * 4          # resident whh + h/c scratch
    avail = max(budget_bytes - fixed, per_ts)
    return int(max(1, min(max_chunk, avail // per_ts, T)))


def lstm_layer(x_gates, whh_t, *, vmem_budget_bytes=20 * 1024 * 1024):
    """One LSTM layer recurrence.

    x_gates: (T, Bp, 4*Hp) bf16, precomputed X @ W_ih + b (lane-aligned gates)
    whh_t:   (Hp, 4*Hp) bf16
    returns: (T, Bp, Hp) bf16 hidden states at every timestep.
    """
    T, Bp, G = x_gates.shape
    Hp = whh_t.shape[0]
    assert G == 4 * Hp
    # Batch split (for dual-TC chips) only when each half still feeds the MXU
    # with >=128 rows; otherwise a single block (no extra serial grid overhead
    # on single-TC v5e/v6e, no MXU starvation on v7x).
    bb = Bp // 2 if (Bp >= 256 and (Bp // 2) % 16 == 0) else Bp

    whh_bytes = whh_t.size * whh_t.dtype.itemsize
    TS = _pick_time_chunk(T, bb, Hp, whh_bytes, vmem_budget_bytes)
    Tp = _round_up(T, TS)
    if Tp != T:
        # Pad time so any T works without collapsing to 1-step grid chunks;
        # padded steps run after the real ones and are sliced off below.
        x_gates = jnp.pad(x_gates, ((0, Tp - T), (0, 0), (0, 0)))

    out = pl.pallas_call(
        _lstm_recurrent_kernel,
        out_shape=jax.ShapeDtypeStruct((Tp, Bp, Hp), jnp.bfloat16),
        grid_spec=pltpu.PrefetchScalarGridSpec(
            num_scalar_prefetch=0,
            grid=(Bp // bb, Tp // TS),
            in_specs=[
                pl.BlockSpec((TS, bb, 4 * Hp), lambda b, t: (t, b, 0)),
                pl.BlockSpec(memory_space=pl.ANY),   # whh stays in HBM
            ],
            out_specs=pl.BlockSpec((TS, bb, Hp), lambda b, t: (t, b, 0)),
            scratch_shapes=[
                pltpu.VMEM((Hp, 4 * Hp), jnp.bfloat16),   # resident whh
                pltpu.SemaphoreType.DMA(()),              # its DMA semaphore
                pltpu.VMEM((bb, Hp), jnp.float32),        # h state
                pltpu.VMEM((bb, Hp), jnp.float32),        # c state
            ],
        ),
        compiler_params=pltpu.CompilerParams(
            dimension_semantics=("parallel", "arbitrary"),
            vmem_limit_bytes=48 * 1024 * 1024),
    )(x_gates, whh_t)
    return out[:T]


# ------------------------------- Full forward --------------------------------

def lstm_model_forward(x_tokens, kparams, num_layers, vocab_size):
    """x_tokens: (T, B) int32 -> logits (T*B, vocab_size)."""
    T, B = x_tokens.shape
    Bp = _round_up(B, SUBLANE)
    # Embedding lookup is a gather; kept as plain JAX glue.
    embeds = jnp.take(kparams["embedding"], x_tokens, axis=0)     # (T, B, Ep)
    h_seq = jnp.pad(embeds, ((0, 0), (0, Bp - B), (0, 0)))        # (T, Bp, Ep)
    for layer in range(num_layers):
        wih_t = kparams[f"wih_t_{layer}"]
        whh_t = kparams[f"whh_t_{layer}"]
        bias = kparams[f"bias_{layer}"]
        Dp = h_seq.shape[-1]
        # Hoisted input projection: one MXU-shaped GEMM over all timesteps,
        # emitted in bf16 to halve the HBM round trip of this intermediate.
        x_gates = matmul_bias(h_seq.reshape(T * Bp, Dp), wih_t, bias,
                              out_dtype=jnp.bfloat16)
        x_gates = x_gates.reshape(T, Bp, wih_t.shape[1])
        h_seq = lstm_layer(x_gates, whh_t)                 # (T, Bp, Hp) bf16
    Hp = h_seq.shape[-1]
    # Drop padded batch rows BEFORE the (largest) vocab projection.
    M = T * B
    h_flat = h_seq[:, :B, :].reshape(M, Hp)
    Mp = _round_up(M, SUBLANE)
    if Mp != M:
        h_flat = jnp.pad(h_flat, ((0, Mp - M), (0, 0)))
    logits_p = matmul_bias(h_flat, kparams["w_out_t"], kparams["b_out"],
                           out_dtype=jnp.float32)          # (Mp, Vp)
    return logits_p[:M, :vocab_size]


# ------------------------------ Pure-JAX reference ---------------------------

def ref_forward(x_tokens, params, num_layers):
    embeds = jnp.take(params["embedding"], x_tokens, axis=0)
    T, B, _ = embeds.shape
    h_seq = embeds
    for layer in range(num_layers):
        w_ih = params[f"w_ih_{layer}"]
        w_hh = params[f"w_hh_{layer}"]
        b = params[f"b_ih_{layer}"] + params[f"b_hh_{layer}"]
        H = w_hh.shape[1]
        h = jnp.zeros((B, H), jnp.float32)
        c = jnp.zeros((B, H), jnp.float32)
        outs = []
        for t in range(T):
            gates = h_seq[t] @ w_ih.T + h @ w_hh.T + b
            i = jax.nn.sigmoid(gates[:, :H])
            f = jax.nn.sigmoid(gates[:, H:2 * H])
            g = jnp.tanh(gates[:, 2 * H:3 * H])
            o = jax.nn.sigmoid(gates[:, 3 * H:])
            c = f * c + i * g
            h = o * jnp.tanh(c)
            outs.append(h)
        h_seq = jnp.stack(outs, axis=0)
    T, B, H = h_seq.shape
    return h_seq.reshape(T * B, H) @ params["w_out"].T + params["b_out"]


# ---------------------------------- Params ------------------------------------

def init_params(key, vocab_size, embedding_dim, hidden_dim, num_layers):
    """PyTorch-layout parameters (used by the reference)."""
    params = {}
    keys = jax.random.split(key, 2 + 4 * num_layers + 2)
    k = iter(keys)
    params["embedding"] = jax.random.normal(
        next(k), (vocab_size + 1, embedding_dim), jnp.float32)
    stdv = 1.0 / jnp.sqrt(hidden_dim)
    for layer in range(num_layers):
        d_in = embedding_dim if layer == 0 else hidden_dim
        params[f"w_ih_{layer}"] = jax.random.uniform(
            next(k), (4 * hidden_dim, d_in), jnp.float32, -stdv, stdv)
        params[f"w_hh_{layer}"] = jax.random.uniform(
            next(k), (4 * hidden_dim, hidden_dim), jnp.float32, -stdv, stdv)
        params[f"b_ih_{layer}"] = jax.random.uniform(
            next(k), (4 * hidden_dim,), jnp.float32, -stdv, stdv)
        params[f"b_hh_{layer}"] = jax.random.uniform(
            next(k), (4 * hidden_dim,), jnp.float32, -stdv, stdv)
    params["w_out"] = jax.random.uniform(
        next(k), (vocab_size, hidden_dim), jnp.float32, -stdv, stdv)
    params["b_out"] = jax.random.uniform(
        next(k), (vocab_size,), jnp.float32, -stdv, stdv)
    return params


def prepare_kernel_params(params, vocab_size, embedding_dim, hidden_dim,
                          num_layers):
    """Pad to vreg alignment and pre-transpose weights ONCE (not per forward).

    Weights are stored bf16 (MXU operands); biases stay f32 (added after f32
    accumulation).  Padded weight rows/cols and bias entries are exactly zero,
    so padded hidden units stay exactly zero through the recurrence.
    """
    E, H, V = embedding_dim, hidden_dim, vocab_size
    Ep, Hp, Vp = (_round_up(d, LANE) for d in (E, H, V))
    kp = {}
    kp["embedding"] = jnp.pad(params["embedding"], ((0, 0), (0, Ep - E)))
    for layer in range(num_layers):
        d_in = E if layer == 0 else H
        Dp = Ep if layer == 0 else Hp
        w_ih = params[f"w_ih_{layer}"]                        # (4H, d_in)
        w_hh = params[f"w_hh_{layer}"]                        # (4H, H)
        b = params[f"b_ih_{layer}"] + params[f"b_hh_{layer}"]  # (4H,)
        wih_t = jnp.zeros((Dp, 4 * Hp), jnp.float32)
        whh_t = jnp.zeros((Hp, 4 * Hp), jnp.float32)
        bias = jnp.zeros((4 * Hp,), jnp.float32)
        # Place each gate block (i, f, g, o) in its own lane-aligned Hp slot.
        for g in range(4):
            wih_t = wih_t.at[:d_in, g * Hp:g * Hp + H].set(
                w_ih[g * H:(g + 1) * H, :].T)
            whh_t = whh_t.at[:H, g * Hp:g * Hp + H].set(
                w_hh[g * H:(g + 1) * H, :].T)
            bias = bias.at[g * Hp:g * Hp + H].set(b[g * H:(g + 1) * H])
        # Zero-padding invariant (padded hidden units must remain exactly 0).
        for g in range(4):
            assert bool(jnp.all(bias[g * Hp + H:(g + 1) * Hp] == 0.0))
        assert bool(jnp.all(whh_t[H:, :] == 0.0))
        kp[f"wih_t_{layer}"] = wih_t.astype(jnp.bfloat16)
        kp[f"whh_t_{layer}"] = whh_t.astype(jnp.bfloat16)
        kp[f"bias_{layer}"] = bias                            # f32
    kp["w_out_t"] = jnp.pad(params["w_out"].T,
                            ((0, Hp - H), (0, Vp - V))).astype(jnp.bfloat16)
    kp["b_out"] = jnp.pad(params["b_out"], (0, Vp - V))       # f32
    return kp


if __name__ == "__main__":
    vocab_size, embedding_dim, hidden_dim, num_layers = 50, 16, 32, 2
    T, B = 8, 4

    key = jax.random.PRNGKey(0)
    k_params, k_tokens = jax.random.split(key)
    params = init_params(k_params, vocab_size, embedding_dim, hidden_dim,
                         num_layers)
    kparams = prepare_kernel_params(params, vocab_size, embedding_dim,
                                    hidden_dim, num_layers)
    x = jax.random.randint(k_tokens, (T, B), 0, vocab_size + 1, jnp.int32)

    fwd = jax.jit(lstm_model_forward, static_argnums=(2, 3))
    out = fwd(x, kparams, num_layers, vocab_size)
    out = jax.block_until_ready(out)

    assert out.shape == (T * B, vocab_size), out.shape
    ref = ref_forward(x, params, num_layers)
    max_err = float(jnp.max(jnp.abs(out - ref)))
    # bf16 MXU operands (f32 accumulation, f32 h/c state) -> bf16-level error.
    assert jnp.allclose(out, ref, atol=5e-2, rtol=5e-2), max_err

    print("KERNEL_OK")
</pallas_src>

<mosaic_0001>
module attributes {stable_mosaic.version = 11 : i64} {
  func.func @_matmul_bias_kernel(%arg0: i32, %arg1: i32, %arg2: i32, %arg3: memref<64x128xf32, #tpu.memory_space<vmem>>, %arg4: memref<128x512xbf16, #tpu.memory_space<vmem>>, %arg5: memref<1x512xf32, #tpu.memory_space<vmem>>, %arg6: memref<64x512xbf16, #tpu.memory_space<vmem>>, %arg7: memref<64x512xf32, #tpu.memory_space<vmem>>) attributes {dimension_semantics = [#tpu.dimension_semantics<parallel>, #tpu.dimension_semantics<parallel>, #tpu.dimension_semantics<arbitrary>], iteration_bounds = array<i64: 1, 1, 1>, scalar_prefetch = 0 : i64, scratch_operands = 1 : i64, tpu.core_type = #tpu.core_type<tc>, window_params = [{transform_indices = @transform_0, window_bounds = array<i64: 64, 128>}, {transform_indices = @transform_1, window_bounds = array<i64: 128, 512>}, {transform_indices = @transform_2, window_bounds = array<i64: 1, 512>}, {transform_indices = @transform_3, window_bounds = array<i64: 64, 512>}]} {
    %c0_i32 = arith.constant 0 : i32
    %0 = arith.cmpi eq, %arg2, %c0_i32 : i32
    %1 = arith.extui %0 : i1 to i32
    %c0_i32_0 = arith.constant 0 : i32
    %2 = arith.cmpi ne, %1, %c0_i32_0 : i32
    scf.if %2 {
      %cst_10 = arith.constant 0.000000e+00 : f32
      %13 = vector.broadcast %cst_10 : f32 to vector<64x512xf32>
      %c0_11 = arith.constant 0 : index
      %c0_12 = arith.constant 0 : index
      %14 = vector.load %arg7[%c0_11, %c0_12] : memref<64x512xf32, #tpu.memory_space<vmem>>, vector<64x512xf32>
      tpu.vector_store %arg7[%c0_11, %c0_12], %13 {strides = array<i32>} : memref<64x512xf32, #tpu.memory_space<vmem>>, vector<64x512xf32>,
    } else {
    }
    %c0 = arith.constant 0 : index
    %c0_1 = arith.constant 0 : index
    %3 = vector.load %arg7[%c0, %c0_1] : memref<64x512xf32, #tpu.memory_space<vmem>>, vector<64x512xf32>
    %c0_2 = arith.constant 0 : index
    %c0_3 = arith.constant 0 : index
    %4 = vector.load %arg3[%c0_2, %c0_3] : memref<64x128xf32, #tpu.memory_space<vmem>>, vector<64x128xf32>
    %5 = arith.truncf %4 : vector<64x128xf32> to vector<64x128xbf16>
    %c0_4 = arith.constant 0 : index
    %c0_5 = arith.constant 0 : index
    %6 = vector.load %arg4[%c0_4, %c0_5] : memref<128x512xbf16, #tpu.memory_space<vmem>>, vector<128x512xbf16>
    %cst = arith.constant dense<0.000000e+00> : vector<64x512xf32>
    %7 = tpu.matmul %5, %6, %cst {dimension_numbers = #tpu.dot_dimension_numbers<[1], [0], [0], [1], [0, 0, 1, 1], [], []>} : vector<64x128xbf16>, vector<128x512xbf16>, vector<64x512xf32> -> vector<64x512xf32>
    %8 = arith.addf %3, %7 : vector<64x512xf32>
    %c0_6 = arith.constant 0 : index
    %c0_7 = arith.constant 0 : index
    %9 = vector.load %arg7[%c0_6, %c0_7] : memref<64x512xf32, #tpu.memory_space<vmem>>, vector<64x512xf32>
    tpu.vector_store %arg7[%c0_6, %c0_7], %8 {strides = array<i32>} : memref<64x512xf32, #tpu.memory_space<vmem>>, vector<64x512xf32>,
    %c0_i32_8 = arith.constant 0 : i32
    %10 = arith.cmpi eq, %arg2, %c0_i32_8 : i32
    %11 = arith.extui %10 : i1 to i32
    %c0_i32_9 = arith.constant 0 : i32
    %12 = arith.cmpi ne, %11, %c0_i32_9 : i32
    scf.if %12 {
      %c0_10 = arith.constant 0 : index
      %c0_11 = arith.constant 0 : index
      %13 = vector.load %arg7[%c0_10, %c0_11] : memref<64x512xf32, #tpu.memory_space<vmem>>, vector<64x512xf32>
      %c0_12 = arith.constant 0 : index
      %c0_13 = arith.constant 0 : index
      %14 = vector.load %arg5[%c0_12, %c0_13] : memref<1x512xf32, #tpu.memory_space<vmem>>, vector<1x512xf32>
      %15 = vector.broadcast %14 : vector<1x512xf32> to vector<64x512xf32>
      %16 = arith.addf %13, %15 : vector<64x512xf32>
      %17 = arith.truncf %16 : vector<64x512xf32> to vector<64x512xbf16>
      %c0_14 = arith.constant 0 : index
      %c0_15 = arith.constant 0 : index
      %18 = vector.load %arg6[%c0_14, %c0_15] : memref<64x512xbf16, #tpu.memory_space<vmem>>, vector<64x512xbf16>
      tpu.vector_store %arg6[%c0_14, %c0_15], %17 {strides = array<i32>} : memref<64x512xbf16, #tpu.memory_space<vmem>>, vector<64x512xbf16>,
    } else {
    }
    return
  }
  func.func @transform_0(%arg0: i32, %arg1: i32, %arg2: i32) -> (i32, i32) {
    %c0_i32 = arith.constant 0 : i32
    return %arg0, %arg2 : i32, i32
  }
  func.func @transform_1(%arg0: i32, %arg1: i32, %arg2: i32) -> (i32, i32) {
    %c0_i32 = arith.constant 0 : i32
    return %arg2, %arg1 : i32, i32
  }
  func.func @transform_2(%arg0: i32, %arg1: i32, %arg2: i32) -> (i32, i32) {
    %c0_i32 = arith.constant 0 : i32
    %c0_i32_0 = arith.constant 0 : i32
    return %c0_i32, %arg1 : i32, i32
  }
  func.func @transform_3(%arg0: i32, %arg1: i32, %arg2: i32) -> (i32, i32) {
    %c0_i32 = arith.constant 0 : i32
    return %arg0, %arg1 : i32, i32
  }
}

module attributes {stable_mosaic.version = 11 : i64} {
  func.func @_matmul_bias_kernel(%arg0: i32, %arg1: i32, %arg2: i32, %arg3: memref<64x128xbf16, #tpu.memory_space<vmem>>, %arg4: memref<128x512xbf16, #tpu.memory_space<vmem>>, %arg5: memref<1x512xf32, #tpu.memory_space<vmem>>, %arg6: memref<64x512xbf16, #tpu.memory_space<vmem>>, %arg7: memref<64x512xf32, #tpu.memory_space<vmem>>) attributes {dimension_semantics = [#tpu.dimension_semantics<parallel>, #tpu.dimension_semantics<parallel>, #tpu.dimension_semantics<arbitrary>], iteration_bounds = array<i64: 1, 1, 1>, scalar_prefetch = 0 : i64, scratch_operands = 1 : i64, tpu.core_type = #tpu.core_type<tc>, window_params = [{transform_indices = @transform_0, window_bounds = array<i64: 64, 128>}, {transform_indices = @transform_1, window_bounds = array<i64: 128, 512>}, {transform_indices = @transform_2, window_bounds = array<i64: 1, 512>}, {transform_indices = @transform_3, window_bounds = array<i64: 64, 512>}]} {
    %c0_i32 = arith.constant 0 : i32
    %0 = arith.cmpi eq, %arg2, %c0_i32 : i32
    %1 = arith.extui %0 : i1 to i32
    %c0_i32_0 = arith.constant 0 : i32
    %2 = arith.cmpi ne, %1, %c0_i32_0 : i32
    scf.if %2 {
      %cst_10 = arith.constant 0.000000e+00 : f32
      %12 = vector.broadcast %cst_10 : f32 to vector<64x512xf32>
      %c0_11 = arith.constant 0 : index
      %c0_12 = arith.constant 0 : index
      %13 = vector.load %arg7[%c0_11, %c0_12] : memref<64x512xf32, #tpu.memory_space<vmem>>, vector<64x512xf32>
      tpu.vector_store %arg7[%c0_11, %c0_12], %12 {strides = array<i32>} : memref<64x512xf32, #tpu.memory_space<vmem>>, vector<64x512xf32>,
    } else {
    }
    %c0 = arith.constant 0 : index
    %c0_1 = arith.constant 0 : index
    %3 = vector.load %arg7[%c0, %c0_1] : memref<64x512xf32, #tpu.memory_space<vmem>>, vector<64x512xf32>
    %c0_2 = arith.constant 0 : index
    %c0_3 = arith.constant 0 : index
    %4 = vector.load %arg3[%c0_2, %c0_3] : memref<64x128xbf16, #tpu.memory_space<vmem>>, vector<64x128xbf16>
    %c0_4 = arith.constant 0 : index
    %c0_5 = arith.constant 0 : index
    %5 = vector.load %arg4[%c0_4, %c0_5] : memref<128x512xbf16, #tpu.memory_space<vmem>>, vector<128x512xbf16>
    %cst = arith.constant dense<0.000000e+00> : vector<64x512xf32>
    %6 = tpu.matmul %4, %5, %cst {dimension_numbers = #tpu.dot_dimension_numbers<[1], [0], [0], [1], [0, 0, 1, 1], [], []>} : vector<64x128xbf16>, vector<128x512xbf16>, vector<64x512xf32> -> vector<64x512xf32>
    %7 = arith.addf %3, %6 : vector<64x512xf32>
    %c0_6 = arith.constant 0 : index
    %c0_7 = arith.constant 0 : index
    %8 = vector.load %arg7[%c0_6, %c0_7] : memref<64x512xf32, #tpu.memory_space<vmem>>, vector<64x512xf32>
    tpu.vector_store %arg7[%c0_6, %c0_7], %7 {strides = array<i32>} : memref<64x512xf32, #tpu.memory_space<vmem>>, vector<64x512xf32>,
    %c0_i32_8 = arith.constant 0 : i32
    %9 = arith.cmpi eq, %arg2, %c0_i32_8 : i32
    %10 = arith.extui %9 : i1 to i32
    %c0_i32_9 = arith.constant 0 : i32
    %11 = arith.cmpi ne, %10, %c0_i32_9 : i32
    scf.if %11 {
      %c0_10 = arith.constant 0 : index
      %c0_11 = arith.constant 0 : index
      %12 = vector.load %arg7[%c0_10, %c0_11] : memref<64x512xf32, #tpu.memory_space<vmem>>, vector<64x512xf32>
      %c0_12 = arith.constant 0 : index
      %c0_13 = arith.constant 0 : index
      %13 = vector.load %arg5[%c0_12, %c0_13] : memref<1x512xf32, #tpu.memory_space<vmem>>, vector<1x512xf32>
      %14 = vector.broadcast %13 : vector<1x512xf32> to vector<64x512xf32>
      %15 = arith.addf %12, %14 : vector<64x512xf32>
      %16 = arith.truncf %15 : vector<64x512xf32> to vector<64x512xbf16>
      %c0_14 = arith.constant 0 : index
      %c0_15 = arith.constant 0 : index
      %17 = vector.load %arg6[%c0_14, %c0_15] : memref<64x512xbf16, #tpu.memory_space<vmem>>, vector<64x512xbf16>
      tpu.vector_store %arg6[%c0_14, %c0_15], %16 {strides = array<i32>} : memref<64x512xbf16, #tpu.memory_space<vmem>>, vector<64x512xbf16>,
    } else {
    }
    return
  }
  func.func @transform_0(%arg0: i32, %arg1: i32, %arg2: i32) -> (i32, i32) {
    %c0_i32 = arith.constant 0 : i32
    return %arg0, %arg2 : i32, i32
  }
  func.func @transform_1(%arg0: i32, %arg1: i32, %arg2: i32) -> (i32, i32) {
    %c0_i32 = arith.constant 0 : i32
    return %arg2, %arg1 : i32, i32
  }
  func.func @transform_2(%arg0: i32, %arg1: i32, %arg2: i32) -> (i32, i32) {
    %c0_i32 = arith.constant 0 : i32
    %c0_i32_0 = arith.constant 0 : i32
    return %c0_i32, %arg1 : i32, i32
  }
  func.func @transform_3(%arg0: i32, %arg1: i32, %arg2: i32) -> (i32, i32) {
    %c0_i32 = arith.constant 0 : i32
    return %arg0, %arg1 : i32, i32
  }
}

module attributes {stable_mosaic.version = 11 : i64} {
  func.func @_lstm_recurrent_kernel(%arg0: i32, %arg1: i32, %arg2: memref<8x8x512xbf16, #tpu.memory_space<vmem>>, %arg3: memref<128x512xbf16, #tpu.memory_space<any>>, %arg4: memref<8x8x128xbf16, #tpu.memory_space<vmem>>, %arg5: memref<128x512xbf16, #tpu.memory_space<vmem>>, %arg6: memref<!tpu.dma_semaphore, #tpu.memory_space<semaphore_mem>>, %arg7: memref<8x128xf32, #tpu.memory_space<vmem>>, %arg8: memref<8x128xf32, #tpu.memory_space<vmem>>) attributes {dimension_semantics = [#tpu.dimension_semantics<parallel>, #tpu.dimension_semantics<arbitrary>], iteration_bounds = array<i64: 1, 1>, scalar_prefetch = 0 : i64, scratch_operands = 4 : i64, tpu.core_type = #tpu.core_type<tc>, window_params = [{transform_indices = @transform_0, window_bounds = array<i64: 8, 8, 512>}, {}, {transform_indices = @transform_2, window_bounds = array<i64: 8, 8, 128>}]} {
    %c0_i32 = arith.constant 0 : i32
    %0 = arith.cmpi eq, %arg1, %c0_i32 : i32
    %1 = arith.extui %0 : i1 to i32
    %c0_i32_0 = arith.constant 0 : i32
    %2 = arith.cmpi ne, %1, %c0_i32_0 : i32
    scf.if %2 {
      tpu.enqueue_dma source(%arg3 : memref<128x512xbf16, #tpu.memory_space<any>>) target(%arg5 : memref<128x512xbf16, #tpu.memory_space<vmem>>) target_semaphore(%arg6 : memref<!tpu.dma_semaphore, #tpu.memory_space<semaphore_mem>>)
      tpu.wait_dma2 semaphore(%arg6 : memref<!tpu.dma_semaphore, #tpu.memory_space<semaphore_mem>>) src(%arg3 : memref<128x512xbf16, #tpu.memory_space<any>>) dst(%arg5 : memref<128x512xbf16, #tpu.memory_space<vmem>>)
      %cst_122 = arith.constant 0.000000e+00 : f32
      %352 = vector.broadcast %cst_122 : f32 to vector<8x128xf32>
      %c0_123 = arith.constant 0 : index
      %c0_124 = arith.constant 0 : index
      %353 = vector.load %arg7[%c0_123, %c0_124] : memref<8x128xf32, #tpu.memory_space<vmem>>, vector<8x128xf32>
      tpu.vector_store %arg7[%c0_123, %c0_124], %352 {strides = array<i32>} : memref<8x128xf32, #tpu.memory_space<vmem>>, vector<8x128xf32>,
      %cst_125 = arith.constant 0.000000e+00 : f32
      %354 = vector.broadcast %cst_125 : f32 to vector<8x128xf32>
      %c0_126 = arith.constant 0 : index
      %c0_127 = arith.constant 0 : index
      %355 = vector.load %arg8[%c0_126, %c0_127] : memref<8x128xf32, #tpu.memory_space<vmem>>, vector<8x128xf32>
      tpu.vector_store %arg8[%c0_126, %c0_127], %354 {strides = array<i32>} : memref<8x128xf32, #tpu.memory_space<vmem>>, vector<8x128xf32>,
    } else {
    }
    %c0 = arith.constant 0 : index
    %c0_1 = arith.constant 0 : index
    %3 = vector.load %arg5[%c0, %c0_1] : memref<128x512xbf16, #tpu.memory_space<vmem>>, vector<128x512xbf16>
    %c0_2 = arith.constant 0 : index
    %c0_3 = arith.constant 0 : index
    %4 = vector.load %arg7[%c0_2, %c0_3] : memref<8x128xf32, #tpu.memory_space<vmem>>, vector<8x128xf32>
    %c0_4 = arith.constant 0 : index
    %c0_5 = arith.constant 0 : index
    %5 = vector.load %arg8[%c0_4, %c0_5] : memref<8x128xf32, #tpu.memory_space<vmem>>, vector<8x128xf32>
    %c0_i32_6 = arith.constant 0 : i32
    %6 = arith.index_cast %c0_i32_6 : i32 to index
    %c0_7 = arith.constant 0 : index
    %c0_8 = arith.constant 0 : index
    %7 = vector.load %arg2[%6, %c0_7, %c0_8] : memref<8x8x512xbf16, #tpu.memory_space<vmem>>, vector<1x8x512xbf16>
    %8 = vector.shape_cast %7 : vector<1x8x512xbf16> to vector<8x512xbf16>
    %9 = arith.extf %8 : vector<8x512xbf16> to vector<8x512xf32>
    %10 = arith.truncf %4 : vector<8x128xf32> to vector<8x128xbf16>
    %cst = arith.constant dense<0.000000e+00> : vector<8x512xf32>
    %11 = tpu.matmul %10, %3, %cst {dimension_numbers = #tpu.dot_dimension_numbers<[1], [0], [0], [1], [0, 0, 1, 1], [], []>} : vector<8x128xbf16>, vector<128x512xbf16>, vector<8x512xf32> -> vector<8x512xf32>
    %12 = arith.addf %9, %11 : vector<8x512xf32>
    %13 = vector.extract_strided_slice %12 {offsets = [0, 0], sizes = [8, 128], strides = [1, 1]} : vector<8x512xf32> to vector<8x128xf32>
    %cst_9 = arith.constant 5.000000e-01 : f32
    %14 = vector.broadcast %cst_9 : f32 to vector<8x128xf32>
    %15 = arith.mulf %14, %13 : vector<8x128xf32>
    %16 = math.tanh %15 : vector<8x128xf32>
    %cst_10 = arith.constant 1.000000e+00 : f32
    %17 = vector.broadcast %cst_10 : f32 to vector<8x128xf32>
    %18 = arith.addf %16, %17 : vector<8x128xf32>
    %cst_11 = arith.constant 5.000000e-01 : f32
    %19 = vector.broadcast %cst_11 : f32 to vector<8x128xf32>
    %20 = arith.mulf %19, %18 : vector<8x128xf32>
    %21 = vector.extract_strided_slice %12 {offsets = [0, 128], sizes = [8, 128], strides = [1, 1]} : vector<8x512xf32> to vector<8x128xf32>
    %cst_12 = arith.constant 5.000000e-01 : f32
    %22 = vector.broadcast %cst_12 : f32 to vector<8x128xf32>
    %23 = arith.mulf %22, %21 : vector<8x128xf32>
    %24 = math.tanh %23 : vector<8x128xf32>
    %cst_13 = arith.constant 1.000000e+00 : f32
    %25 = vector.broadcast %cst_13 : f32 to vector<8x128xf32>
    %26 = arith.addf %24, %25 : vector<8x128xf32>
    %cst_14 = arith.constant 5.000000e-01 : f32
    %27 = vector.broadcast %cst_14 : f32 to vector<8x128xf32>
    %28 = arith.mulf %27, %26 : vector<8x128xf32>
    %29 = vector.extract_strided_slice %12 {offsets = [0, 256], sizes = [8, 128], strides = [1, 1]} : vector<8x512xf32> to vector<8x128xf32>
    %30 = math.tanh %29 : vector<8x128xf32>
    %31 = vector.extract_strided_slice %12 {offsets = [0, 384], sizes = [8, 128], strides = [1, 1]} : vector<8x512xf32> to vector<8x128xf32>
    %cst_15 = arith.constant 5.000000e-01 : f32
    %32 = vector.broadcast %cst_15 : f32 to vector<8x128xf32>
    %33 = arith.mulf %32, %31 : vector<8x128xf32>
    %34 = math.tanh %33 : vector<8x128xf32>
    %cst_16 = arith.constant 1.000000e+00 : f32
    %35 = vector.broadcast %cst_16 : f32 to vector<8x128xf32>
    %36 = arith.addf %34, %35 : vector<8x128xf32>
    %cst_17 = arith.constant 5.000000e-01 : f32
    %37 = vector.broadcast %cst_17 : f32 to vector<8x128xf32>
    %38 = arith.mulf %37, %36 : vector<8x128xf32>
    %39 = arith.mulf %28, %5 : vector<8x128xf32>
    %40 = arith.mulf %20, %30 : vector<8x128xf32>
    %41 = arith.addf %39, %40 : vector<8x128xf32>
    %42 = math.tanh %41 : vector<8x128xf32>
    %43 = arith.mulf %38, %42 : vector<8x128xf32>
    %44 = arith.truncf %43 : vector<8x128xf32> to vector<8x128xbf16>
    %45 = arith.index_cast %c0_i32_6 : i32 to index
    %c0_18 = arith.constant 0 : index
    %c0_19 = arith.constant 0 : index
    %46 = vector.load %arg4[%45, %c0_18, %c0_19] : memref<8x8x128xbf16, #tpu.memory_space<vmem>>, vector<1x8x128xbf16>
    %47 = vector.shape_cast %46 : vector<1x8x128xbf16> to vector<8x128xbf16>
    %48 = vector.shape_cast %44 : vector<8x128xbf16> to vector<1x8x128xbf16>
    tpu.vector_store %arg4[%45, %c0_18, %c0_19], %48 {strides = array<i32>} : memref<8x8x128xbf16, #tpu.memory_space<vmem>>, vector<1x8x128xbf16>,
    %c1_i32 = arith.constant 1 : i32
    %49 = arith.index_cast %c1_i32 : i32 to index
    %c0_20 = arith.constant 0 : index
    %c0_21 = arith.constant 0 : index
    %50 = vector.load %arg2[%49, %c0_20, %c0_21] : memref<8x8x512xbf16, #tpu.memory_space<vmem>>, vector<1x8x512xbf16>
    %51 = vector.shape_cast %50 : vector<1x8x512xbf16> to vector<8x512xbf16>
    %52 = arith.extf %51 : vector<8x512xbf16> to vector<8x512xf32>
    %53 = arith.truncf %43 : vector<8x128xf32> to vector<8x128xbf16>
    %cst_22 = arith.constant dense<0.000000e+00> : vector<8x512xf32>
    %54 = tpu.matmul %53, %3, %cst_22 {dimension_numbers = #tpu.dot_dimension_numbers<[1], [0], [0], [1], [0, 0, 1, 1], [], []>} : vector<8x128xbf16>, vector<128x512xbf16>, vector<8x512xf32> -> vector<8x512xf32>
    %55 = arith.addf %52, %54 : vector<8x512xf32>
    %56 = vector.extract_strided_slice %55 {offsets = [0, 0], sizes = [8, 128], strides = [1, 1]} : vector<8x512xf32> to vector<8x128xf32>
    %cst_23 = arith.constant 5.000000e-01 : f32
    %57 = vector.broadcast %cst_23 : f32 to vector<8x128xf32>
    %58 = arith.mulf %57, %56 : vector<8x128xf32>
    %59 = math.tanh %58 : vector<8x128xf32>
    %cst_24 = arith.constant 1.000000e+00 : f32
    %60 = vector.broadcast %cst_24 : f32 to vector<8x128xf32>
    %61 = arith.addf %59, %60 : vector<8x128xf32>
    %cst_25 = arith.constant 5.000000e-01 : f32
    %62 = vector.broadcast %cst_25 : f32 to vector<8x128xf32>
    %63 = arith.mulf %62, %61 : vector<8x128xf32>
    %64 = vector.extract_strided_slice %55 {offsets = [0, 128], sizes = [8, 128], strides = [1, 1]} : vector<8x512xf32> to vector<8x128xf32>
    %cst_26 = arith.constant 5.000000e-01 : f32
    %65 = vector.broadcast %cst_26 : f32 to vector<8x128xf32>
    %66 = arith.mulf %65, %64 : vector<8x128xf32>
    %67 = math.tanh %66 : vector<8x128xf32>
    %cst_27 = arith.constant 1.000000e+00 : f32
    %68 = vector.broadcast %cst_27 : f32 to vector<8x128xf32>
    %69 = arith.addf %67, %68 : vector<8x128xf32>
    %cst_28 = arith.constant 5.000000e-01 : f32
    %70 = vector.broadcast %cst_28 : f32 to vector<8x128xf32>
    %71 = arith.mulf %70, %69 : vector<8x128xf32>
    %72 = vector.extract_strided_slice %55 {offsets = [0, 256], sizes = [8, 128], strides = [1, 1]} : vector<8x512xf32> to vector<8x128xf32>
    %73 = math.tanh %72 : vector<8x128xf32>
    %74 = vector.extract_strided_slice %55 {offsets = [0, 384], sizes = [8, 128], strides = [1, 1]} : vector<8x512xf32> to vector<8x128xf32>
    %cst_29 = arith.constant 5.000000e-01 : f32
    %75 = vector.broadcast %cst_29 : f32 to vector<8x128xf32>
    %76 = arith.mulf %75, %74 : vector<8x128xf32>
    %77 = math.tanh %76 : vector<8x128xf32>
    %cst_30 = arith.constant 1.000000e+00 : f32
    %78 = vector.broadcast %cst_30 : f32 to vector<8x128xf32>
    %79 = arith.addf %77, %78 : vector<8x128xf32>
    %cst_31 = arith.constant 5.000000e-01 : f32
    %80 = vector.broadcast %cst_31 : f32 to vector<8x128xf32>
    %81 = arith.mulf %80, %79 : vector<8x128xf32>
    %82 = arith.mulf %71, %41 : vector<8x128xf32>
    %83 = arith.mulf %63, %73 : vector<8x128xf32>
    %84 = arith.addf %82, %83 : vector<8x128xf32>
    %85 = math.tanh %84 : vector<8x128xf32>
    %86 = arith.mulf %81, %85 : vector<8x128xf32>
    %87 = arith.truncf %86 : vector<8x128xf32> to vector<8x128xbf16>
    %88 = arith.index_cast %c1_i32 : i32 to index
    %c0_32 = arith.constant 0 : index
    %c0_33 = arith.constant 0 : index
    %89 = vector.load %arg4[%88, %c0_32, %c0_33] : memref<8x8x128xbf16, #tpu.memory_space<vmem>>, vector<1x8x128xbf16>
    %90 = vector.shape_cast %89 : vector<1x8x128xbf16> to vector<8x128xbf16>
    %91 = vector.shape_cast %87 : vector<8x128xbf16> to vector<1x8x128xbf16>
    tpu.vector_store %arg4[%88, %c0_32, %c0_33], %91 {strides = array<i32>} : memref<8x8x128xbf16, #tpu.memory_space<vmem>>, vector<1x8x128xbf16>,
    %c2_i32 = arith.constant 2 : i32
    %92 = arith.index_cast %c2_i32 : i32 to index
    %c0_34 = arith.constant 0 : index
    %c0_35 = arith.constant 0 : index
    %93 = vector.load %arg2[%92, %c0_34, %c0_35] : memref<8x8x512xbf16, #tpu.memory_space<vmem>>, vector<1x8x512xbf16>
    %94 = vector.shape_cast %93 : vector<1x8x512xbf16> to vector<8x512xbf16>
    %95 = arith.extf %94 : vector<8x512xbf16> to vector<8x512xf32>
    %96 = arith.truncf %86 : vector<8x128xf32> to vector<8x128xbf16>
    %cst_36 = arith.constant dense<0.000000e+00> : vector<8x512xf32>
    %97 = tpu.matmul %96, %3, %cst_36 {dimension_numbers = #tpu.dot_dimension_numbers<[1], [0], [0], [1], [0, 0, 1, 1], [], []>} : vector<8x128xbf16>, vector<128x512xbf16>, vector<8x512xf32> -> vector<8x512xf32>
    %98 = arith.addf %95, %97 : vector<8x512xf32>
    %99 = vector.extract_strided_slice %98 {offsets = [0, 0], sizes = [8, 128], strides = [1, 1]} : vector<8x512xf32> to vector<8x128xf32>
    %cst_37 = arith.constant 5.000000e-01 : f32
    %100 = vector.broadcast %cst_37 : f32 to vector<8x128xf32>
    %101 = arith.mulf %100, %99 : vector<8x128xf32>
    %102 = math.tanh %101 : vector<8x128xf32>
    %cst_38 = arith.constant 1.000000e+00 : f32
    %103 = vector.broadcast %cst_38 : f32 to vector<8x128xf32>
    %104 = arith.addf %102, %103 : vector<8x128xf32>
    %cst_39 = arith.constant 5.000000e-01 : f32
    %105 = vector.broadcast %cst_39 : f32 to vector<8x128xf32>
    %106 = arith.mulf %105, %104 : vector<8x128xf32>
    %107 = vector.extract_strided_slice %98 {offsets = [0, 128], sizes = [8, 128], strides = [1, 1]} : vector<8x512xf32> to vector<8x128xf32>
    %cst_40 = arith.constant 5.000000e-01 : f32
    %108 = vector.broadcast %cst_40 : f32 to vector<8x128xf32>
    %109 = arith.mulf %108, %107 : vector<8x128xf32>
    %110 = math.tanh %109 : vector<8x128xf32>
    %cst_41 = arith.constant 1.000000e+00 : f32
    %111 = vector.broadcast %cst_41 : f32 to vector<8x128xf32>
    %112 = arith.addf %110, %111 : vector<8x128xf32>
    %cst_42 = arith.constant 5.000000e-01 : f32
    %113 = vector.broadcast %cst_42 : f32 to vector<8x128xf32>
    %114 = arith.mulf %113, %112 : vector<8x128xf32>
    %115 = vector.extract_strided_slice %98 {offsets = [0, 256], sizes = [8, 128], strides = [1, 1]} : vector<8x512xf32> to vector<8x128xf32>
    %116 = math.tanh %115 : vector<8x128xf32>
    %117 = vector.extract_strided_slice %98 {offsets = [0, 384], sizes = [8, 128], strides = [1, 1]} : vector<8x512xf32> to vector<8x128xf32>
    %cst_43 = arith.constant 5.000000e-01 : f32
    %118 = vector.broadcast %cst_43 : f32 to vector<8x128xf32>
    %119 = arith.mulf %118, %117 : vector<8x128xf32>
    %120 = math.tanh %119 : vector<8x128xf32>
    %cst_44 = arith.constant 1.000000e+00 : f32
    %121 = vector.broadcast %cst_44 : f32 to vector<8x128xf32>
    %122 = arith.addf %120, %121 : vector<8x128xf32>
    %cst_45 = arith.constant 5.000000e-01 : f32
    %123 = vector.broadcast %cst_45 : f32 to vector<8x128xf32>
    %124 = arith.mulf %123, %122 : vector<8x128xf32>
    %125 = arith.mulf %114, %84 : vector<8x128xf32>
    %126 = arith.mulf %106, %116 : vector<8x128xf32>
    %127 = arith.addf %125, %126 : vector<8x128xf32>
    %128 = math.tanh %127 : vector<8x128xf32>
    %129 = arith.mulf %124, %128 : vector<8x128xf32>
    %130 = arith.truncf %129 : vector<8x128xf32> to vector<8x128xbf16>
    %131 = arith.index_cast %c2_i32 : i32 to index
    %c0_46 = arith.constant 0 : index
    %c0_47 = arith.constant 0 : index
    %132 = vector.load %arg4[%131, %c0_46, %c0_47] : memref<8x8x128xbf16, #tpu.memory_space<vmem>>, vector<1x8x128xbf16>
    %133 = vector.shape_cast %132 : vector<1x8x128xbf16> to vector<8x128xbf16>
    %134 = vector.shape_cast %130 : vector<8x128xbf16> to vector<1x8x128xbf16>
    tpu.vector_store %arg4[%131, %c0_46, %c0_47], %134 {strides = array<i32>} : memref<8x8x128xbf16, #tpu.memory_space<vmem>>, vector<1x8x128xbf16>,
    %c3_i32 = arith.constant 3 : i32
    %135 = arith.index_cast %c3_i32 : i32 to index
    %c0_48 = arith.constant 0 : index
    %c0_49 = arith.constant 0 : index
    %136 = vector.load %arg2[%135, %c0_48, %c0_49] : memref<8x8x512xbf16, #tpu.memory_space<vmem>>, vector<1x8x512xbf16>
    %137 = vector.shape_cast %136 : vector<1x8x512xbf16> to vector<8x512xbf16>
    %138 = arith.extf %137 : vector<8x512xbf16> to vector<8x512xf32>
    %139 = arith.truncf %129 : vector<8x128xf32> to vector<8x128xbf16>
    %cst_50 = arith.constant dense<0.000000e+00> : vector<8x512xf32>
    %140 = tpu.matmul %139, %3, %cst_50 {dimension_numbers = #tpu.dot_dimension_numbers<[1], [0], [0], [1], [0, 0, 1, 1], [], []>} : vector<8x128xbf16>, vector<128x512xbf16>, vector<8x512xf32> -> vector<8x512xf32>
    %141 = arith.addf %138, %140 : vector<8x512xf32>
    %142 = vector.extract_strided_slice %141 {offsets = [0, 0], sizes = [8, 128], strides = [1, 1]} : vector<8x512xf32> to vector<8x128xf32>
    %cst_51 = arith.constant 5.000000e-01 : f32
    %143 = vector.broadcast %cst_51 : f32 to vector<8x128xf32>
    %144 = arith.mulf %143, %142 : vector<8x128xf32>
    %145 = math.tanh %144 : vector<8x128xf32>
    %cst_52 = arith.constant 1.000000e+00 : f32
    %146 = vector.broadcast %cst_52 : f32 to vector<8x128xf32>
    %147 = arith.addf %145, %146 : vector<8x128xf32>
    %cst_53 = arith.constant 5.000000e-01 : f32
    %148 = vector.broadcast %cst_53 : f32 to vector<8x128xf32>
    %149 = arith.mulf %148, %147 : vector<8x128xf32>
    %150 = vector.extract_strided_slice %141 {offsets = [0, 128], sizes = [8, 128], strides = [1, 1]} : vector<8x512xf32> to vector<8x128xf32>
    %cst_54 = arith.constant 5.000000e-01 : f32
    %151 = vector.broadcast %cst_54 : f32 to vector<8x128xf32>
    %152 = arith.mulf %151, %150 : vector<8x128xf32>
    %153 = math.tanh %152 : vector<8x128xf32>
    %cst_55 = arith.constant 1.000000e+00 : f32
    %154 = vector.broadcast %cst_55 : f32 to vector<8x128xf32>
    %155 = arith.addf %153, %154 : vector<8x128xf32>
    %cst_56 = arith.constant 5.000000e-01 : f32
    %156 = vector.broadcast %cst_56 : f32 to vector<8x128xf32>
    %157 = arith.mulf %156, %155 : vector<8x128xf32>
    %158 = vector.extract_strided_slice %141 {offsets = [0, 256], sizes = [8, 128], strides = [1, 1]} : vector<8x512xf32> to vector<8x128xf32>
    %159 = math.tanh %158 : vector<8x128xf32>
    %160 = vector.extract_strided_slice %141 {offsets = [0, 384], sizes = [8, 128], strides = [1, 1]} : vector<8x512xf32> to vector<8x128xf32>
    %cst_57 = arith.constant 5.000000e-01 : f32
    %161 = vector.broadcast %cst_57 : f32 to vector<8x128xf32>
    %162 = arith.mulf %161, %160 : vector<8x128xf32>
    %163 = math.tanh %162 : vector<8x128xf32>
    %cst_58 = arith.constant 1.000000e+00 : f32
    %164 = vector.broadcast %cst_58 : f32 to vector<8x128xf32>
    %165 = arith.addf %163, %164 : vector<8x128xf32>
    %cst_59 = arith.constant 5.000000e-01 : f32
    %166 = vector.broadcast %cst_59 : f32 to vector<8x128xf32>
    %167 = arith.mulf %166, %165 : vector<8x128xf32>
    %168 = arith.mulf %157, %127 : vector<8x128xf32>
    %169 = arith.mulf %149, %159 : vector<8x128xf32>
    %170 = arith.addf %168, %169 : vector<8x128xf32>
    %171 = math.tanh %170 : vector<8x128xf32>
    %172 = arith.mulf %167, %171 : vector<8x128xf32>
    %173 = arith.truncf %172 : vector<8x128xf32> to vector<8x128xbf16>
    %174 = arith.index_cast %c3_i32 : i32 to index
    %c0_60 = arith.constant 0 : index
    %c0_61 = arith.constant 0 : index
    %175 = vector.load %arg4[%174, %c0_60, %c0_61] : memref<8x8x128xbf16, #tpu.memory_space<vmem>>, vector<1x8x128xbf16>
    %176 = vector.shape_cast %175 : vector<1x8x128xbf16> to vector<8x128xbf16>
    %177 = vector.shape_cast %173 : vector<8x128xbf16> to vector<1x8x128xbf16>
    tpu.vector_store %arg4[%174, %c0_60, %c0_61], %177 {strides = array<i32>} : memref<8x8x128xbf16, #tpu.memory_space<vmem>>, vector<1x8x128xbf16>,
    %c4_i32 = arith.constant 4 : i32
    %178 = arith.index_cast %c4_i32 : i32 to index
    %c0_62 = arith.constant 0 : index
    %c0_63 = arith.constant 0 : index
    %179 = vector.load %arg2[%178, %c0_62, %c0_63] : memref<8x8x512xbf16, #tpu.memory_space<vmem>>, vector<1x8x512xbf16>
    %180 = vector.shape_cast %179 : vector<1x8x512xbf16> to vector<8x512xbf16>
    %181 = arith.extf %180 : vector<8x512xbf16> to vector<8x512xf32>
    %182 = arith.truncf %172 : vector<8x128xf32> to vector<8x128xbf16>
    %cst_64 = arith.constant dense<0.000000e+00> : vector<8x512xf32>
    %183 = tpu.matmul %182, %3, %cst_64 {dimension_numbers = #tpu.dot_dimension_numbers<[1], [0], [0], [1], [0, 0, 1, 1], [], []>} : vector<8x128xbf16>, vector<128x512xbf16>, vector<8x512xf32> -> vector<8x512xf32>
    %184 = arith.addf %181, %183 : vector<8x512xf32>
    %185 = vector.extract_strided_slice %184 {offsets = [0, 0], sizes = [8, 128], strides = [1, 1]} : vector<8x512xf32> to vector<8x128xf32>
    %cst_65 = arith.constant 5.000000e-01 : f32
    %186 = vector.broadcast %cst_65 : f32 to vector<8x128xf32>
    %187 = arith.mulf %186, %185 : vector<8x128xf32>
    %188 = math.tanh %187 : vector<8x128xf32>
    %cst_66 = arith.constant 1.000000e+00 : f32
    %189 = vector.broadcast %cst_66 : f32 to vector<8x128xf32>
    %190 = arith.addf %188, %189 : vector<8x128xf32>
    %cst_67 = arith.constant 5.000000e-01 : f32
    %191 = vector.broadcast %cst_67 : f32 to vector<8x128xf32>
    %192 = arith.mulf %191, %190 : vector<8x128xf32>
    %193 = vector.extract_strided_slice %184 {offsets = [0, 128], sizes = [8, 128], strides = [1, 1]} : vector<8x512xf32> to vector<8x128xf32>
    %cst_68 = arith.constant 5.000000e-01 : f32
    %194 = vector.broadcast %cst_68 : f32 to vector<8x128xf32>
    %195 = arith.mulf %194, %193 : vector<8x128xf32>
    %196 = math.tanh %195 : vector<8x128xf32>
    %cst_69 = arith.constant 1.000000e+00 : f32
    %197 = vector.broadcast %cst_69 : f32 to vector<8x128xf32>
    %198 = arith.addf %196, %197 : vector<8x128xf32>
    %cst_70 = arith.constant 5.000000e-01 : f32
    %199 = vector.broadcast %cst_70 : f32 to vector<8x128xf32>
    %200 = arith.mulf %199, %198 : vector<8x128xf32>
    %201 = vector.extract_strided_slice %184 {offsets = [0, 256], sizes = [8, 128], strides = [1, 1]} : vector<8x512xf32> to vector<8x128xf32>
    %202 = math.tanh %201 : vector<8x128xf32>
    %203 = vector.extract_strided_slice %184 {offsets = [0, 384], sizes = [8, 128], strides = [1, 1]} : vector<8x512xf32> to vector<8x128xf32>
    %cst_71 = arith.constant 5.000000e-01 : f32
    %204 = vector.broadcast %cst_71 : f32 to vector<8x128xf32>
    %205 = arith.mulf %204, %203 : vector<8x128xf32>
    %206 = math.tanh %205 : vector<8x128xf32>
    %cst_72 = arith.constant 1.000000e+00 : f32
    %207 = vector.broadcast %cst_72 : f32 to vector<8x128xf32>
    %208 = arith.addf %206, %207 : vector<8x128xf32>
    %cst_73 = arith.constant 5.000000e-01 : f32
    %209 = vector.broadcast %cst_73 : f32 to vector<8x128xf32>
    %210 = arith.mulf %209, %208 : vector<8x128xf32>
    %211 = arith.mulf %200, %170 : vector<8x128xf32>
    %212 = arith.mulf %192, %202 : vector<8x128xf32>
    %213 = arith.addf %211, %212 : vector<8x128xf32>
    %214 = math.tanh %213 : vector<8x128xf32>
    %215 = arith.mulf %210, %214 : vector<8x128xf32>
    %216 = arith.truncf %215 : vector<8x128xf32> to vector<8x128xbf16>
    %217 = arith.index_cast %c4_i32 : i32 to index
    %c0_74 = arith.constant 0 : index
    %c0_75 = arith.constant 0 : index
    %218 = vector.load %arg4[%217, %c0_74, %c0_75] : memref<8x8x128xbf16, #tpu.memory_space<vmem>>, vector<1x8x128xbf16>
    %219 = vector.shape_cast %218 : vector<1x8x128xbf16> to vector<8x128xbf16>
    %220 = vector.shape_cast %216 : vector<8x128xbf16> to vector<1x8x128xbf16>
    tpu.vector_store %arg4[%217, %c0_74, %c0_75], %220 {strides = array<i32>} : memref<8x8x128xbf16, #tpu.memory_space<vmem>>, vector<1x8x128xbf16>,
    %c5_i32 = arith.constant 5 : i32
    %221 = arith.index_cast %c5_i32 : i32 to index
    %c0_76 = arith.constant 0 : index
    %c0_77 = arith.constant 0 : index
    %222 = vector.load %arg2[%221, %c0_76, %c0_77] : memref<8x8x512xbf16, #tpu.memory_space<vmem>>, vector<1x8x512xbf16>
    %223 = vector.shape_cast %222 : vector<1x8x512xbf16> to vector<8x512xbf16>
    %224 = arith.extf %223 : vector<8x512xbf16> to vector<8x512xf32>
    %225 = arith.truncf %215 : vector<8x128xf32> to vector<8x128xbf16>
    %cst_78 = arith.constant dense<0.000000e+00> : vector<8x512xf32>
    %226 = tpu.matmul %225, %3, %cst_78 {dimension_numbers = #tpu.dot_dimension_numbers<[1], [0], [0], [1], [0, 0, 1, 1], [], []>} : vector<8x128xbf16>, vector<128x512xbf16>, vector<8x512xf32> -> vector<8x512xf32>
    %227 = arith.addf %224, %226 : vector<8x512xf32>
    %228 = vector.extract_strided_slice %227 {offsets = [0, 0], sizes = [8, 128], strides = [1, 1]} : vector<8x512xf32> to vector<8x128xf32>
    %cst_79 = arith.constant 5.000000e-01 : f32
    %229 = vector.broadcast %cst_79 : f32 to vector<8x128xf32>
    %230 = arith.mulf %229, %228 : vector<8x128xf32>
    %231 = math.tanh %230 : vector<8x128xf32>
    %cst_80 = arith.constant 1.000000e+00 : f32
    %232 = vector.broadcast %cst_80 : f32 to vector<8x128xf32>
    %233 = arith.addf %231, %232 : vector<8x128xf32>
    %cst_81 = arith.constant 5.000000e-01 : f32
    %234 = vector.broadcast %cst_81 : f32 to vector<8x128xf32>
    %235 = arith.mulf %234, %233 : vector<8x128xf32>
    %236 = vector.extract_strided_slice %227 {offsets = [0, 128], sizes = [8, 128], strides = [1, 1]} : vector<8x512xf32> to vector<8x128xf32>
    %cst_82 = arith.constant 5.000000e-01 : f32
    %237 = vector.broadcast %cst_82 : f32 to vector<8x128xf32>
    %238 = arith.mulf %237, %236 : vector<8x128xf32>
    %239 = math.tanh %238 : vector<8x128xf32>
    %cst_83 = arith.constant 1.000000e+00 : f32
    %240 = vector.broadcast %cst_83 : f32 to vector<8x128xf32>
    %241 = arith.addf %239, %240 : vector<8x128xf32>
    %cst_84 = arith.constant 5.000000e-01 : f32
    %242 = vector.broadcast %cst_84 : f32 to vector<8x128xf32>
    %243 = arith.mulf %242, %241 : vector<8x128xf32>
    %244 = vector.extract_strided_slice %227 {offsets = [0, 256], sizes = [8, 128], strides = [1, 1]} : vector<8x512xf32> to vector<8x128xf32>
    %245 = math.tanh %244 : vector<8x128xf32>
    %246 = vector.extract_strided_slice %227 {offsets = [0, 384], sizes = [8, 128], strides = [1, 1]} : vector<8x512xf32> to vector<8x128xf32>
    %cst_85 = arith.constant 5.000000e-01 : f32
    %247 = vector.broadcast %cst_85 : f32 to vector<8x128xf32>
    %248 = arith.mulf %247, %246 : vector<8x128xf32>
    %249 = math.tanh %248 : vector<8x128xf32>
    %cst_86 = arith.constant 1.000000e+00 : f32
    %250 = vector.broadcast %cst_86 : f32 to vector<8x128xf32>
    %251 = arith.addf %249, %250 : vector<8x128xf32>
    %cst_87 = arith.constant 5.000000e-01 : f32
    %252 = vector.broadcast %cst_87 : f32 to vector<8x128xf32>
    %253 = arith.mulf %252, %251 : vector<8x128xf32>
    %254 = arith.mulf %243, %213 : vector<8x128xf32>
    %255 = arith.mulf %235, %245 : vector<8x128xf32>
    %256 = arith.addf %254, %255 : vector<8x128xf32>
    %257 = math.tanh %256 : vector<8x128xf32>
    %258 = arith.mulf %253, %257 : vector<8x128xf32>
    %259 = arith.truncf %258 : vector<8x128xf32> to vector<8x128xbf16>
    %260 = arith.index_cast %c5_i32 : i32 to index
    %c0_88 = arith.constant 0 : index
    %c0_89 = arith.constant 0 : index
    %261 = vector.load %arg4[%260, %c0_88, %c0_89] : memref<8x8x128xbf16, #tpu.memory_space<vmem>>, vector<1x8x128xbf16>
    %262 = vector.shape_cast %261 : vector<1x8x128xbf16> to vector<8x128xbf16>
    %263 = vector.shape_cast %259 : vector<8x128xbf16> to vector<1x8x128xbf16>
    tpu.vector_store %arg4[%260, %c0_88, %c0_89], %263 {strides = array<i32>} : memref<8x8x128xbf16, #tpu.memory_space<vmem>>, vector<1x8x128xbf16>,
    %c6_i32 = arith.constant 6 : i32
    %264 = arith.index_cast %c6_i32 : i32 to index
    %c0_90 = arith.constant 0 : index
    %c0_91 = arith.constant 0 : index
    %265 = vector.load %arg2[%264, %c0_90, %c0_91] : memref<8x8x512xbf16, #tpu.memory_space<vmem>>, vector<1x8x512xbf16>
    %266 = vector.shape_cast %265 : vector<1x8x512xbf16> to vector<8x512xbf16>
    %267 = arith.extf %266 : vector<8x512xbf16> to vector<8x512xf32>
    %268 = arith.truncf %258 : vector<8x128xf32> to vector<8x128xbf16>
    %cst_92 = arith.constant dense<0.000000e+00> : vector<8x512xf32>
    %269 = tpu.matmul %268, %3, %cst_92 {dimension_numbers = #tpu.dot_dimension_numbers<[1], [0], [0], [1], [0, 0, 1, 1], [], []>} : vector<8x128xbf16>, vector<128x512xbf16>, vector<8x512xf32> -> vector<8x512xf32>
    %270 = arith.addf %267, %269 : vector<8x512xf32>
    %271 = vector.extract_strided_slice %270 {offsets = [0, 0], sizes = [8, 128], strides = [1, 1]} : vector<8x512xf32> to vector<8x128xf32>
    %cst_93 = arith.constant 5.000000e-01 : f32
    %272 = vector.broadcast %cst_93 : f32 to vector<8x128xf32>
    %273 = arith.mulf %272, %271 : vector<8x128xf32>
    %274 = math.tanh %273 : vector<8x128xf32>
    %cst_94 = arith.constant 1.000000e+00 : f32
    %275 = vector.broadcast %cst_94 : f32 to vector<8x128xf32>
    %276 = arith.addf %274, %275 : vector<8x128xf32>
    %cst_95 = arith.constant 5.000000e-01 : f32
    %277 = vector.broadcast %cst_95 : f32 to vector<8x128xf32>
    %278 = arith.mulf %277, %276 : vector<8x128xf32>
    %279 = vector.extract_strided_slice %270 {offsets = [0, 128], sizes = [8, 128], strides = [1, 1]} : vector<8x512xf32> to vector<8x128xf32>
    %cst_96 = arith.constant 5.000000e-01 : f32
    %280 = vector.broadcast %cst_96 : f32 to vector<8x128xf32>
    %281 = arith.mulf %280, %279 : vector<8x128xf32>
    %282 = math.tanh %281 : vector<8x128xf32>
    %cst_97 = arith.constant 1.000000e+00 : f32
    %283 = vector.broadcast %cst_97 : f32 to vector<8x128xf32>
    %284 = arith.addf %282, %283 : vector<8x128xf32>
    %cst_98 = arith.constant 5.000000e-01 : f32
    %285 = vector.broadcast %cst_98 : f32 to vector<8x128xf32>
    %286 = arith.mulf %285, %284 : vector<8x128xf32>
    %287 = vector.extract_strided_slice %270 {offsets = [0, 256], sizes = [8, 128], strides = [1, 1]} : vector<8x512xf32> to vector<8x128xf32>
    %288 = math.tanh %287 : vector<8x128xf32>
    %289 = vector.extract_strided_slice %270 {offsets = [0, 384], sizes = [8, 128], strides = [1, 1]} : vector<8x512xf32> to vector<8x128xf32>
    %cst_99 = arith.constant 5.000000e-01 : f32
    %290 = vector.broadcast %cst_99 : f32 to vector<8x128xf32>
    %291 = arith.mulf %290, %289 : vector<8x128xf32>
    %292 = math.tanh %291 : vector<8x128xf32>
    %cst_100 = arith.constant 1.000000e+00 : f32
    %293 = vector.broadcast %cst_100 : f32 to vector<8x128xf32>
    %294 = arith.addf %292, %293 : vector<8x128xf32>
    %cst_101 = arith.constant 5.000000e-01 : f32
    %295 = vector.broadcast %cst_101 : f32 to vector<8x128xf32>
    %296 = arith.mulf %295, %294 : vector<8x128xf32>
    %297 = arith.mulf %286, %256 : vector<8x128xf32>
    %298 = arith.mulf %278, %288 : vector<8x128xf32>
    %299 = arith.addf %297, %298 : vector<8x128xf32>
    %300 = math.tanh %299 : vector<8x128xf32>
    %301 = arith.mulf %296, %300 : vector<8x128xf32>
    %302 = arith.truncf %301 : vector<8x128xf32> to vector<8x128xbf16>
    %303 = arith.index_cast %c6_i32 : i32 to index
    %c0_102 = arith.constant 0 : index
    %c0_103 = arith.constant 0 : index
    %304 = vector.load %arg4[%303, %c0_102, %c0_103] : memref<8x8x128xbf16, #tpu.memory_space<vmem>>, vector<1x8x128xbf16>
    %305 = vector.shape_cast %304 : vector<1x8x128xbf16> to vector<8x128xbf16>
    %306 = vector.shape_cast %302 : vector<8x128xbf16> to vector<1x8x128xbf16>
    tpu.vector_store %arg4[%303, %c0_102, %c0_103], %306 {strides = array<i32>} : memref<8x8x128xbf16, #tpu.memory_space<vmem>>, vector<1x8x128xbf16>,
    %c7_i32 = arith.constant 7 : i32
    %307 = arith.index_cast %c7_i32 : i32 to index
    %c0_104 = arith.constant 0 : index
    %c0_105 = arith.constant 0 : index
    %308 = vector.load %arg2[%307, %c0_104, %c0_105] : memref<8x8x512xbf16, #tpu.memory_space<vmem>>, vector<1x8x512xbf16>
    %309 = vector.shape_cast %308 : vector<1x8x512xbf16> to vector<8x512xbf16>
    %310 = arith.extf %309 : vector<8x512xbf16> to vector<8x512xf32>
    %311 = arith.truncf %301 : vector<8x128xf32> to vector<8x128xbf16>
    %cst_106 = arith.constant dense<0.000000e+00> : vector<8x512xf32>
    %312 = tpu.matmul %311, %3, %cst_106 {dimension_numbers = #tpu.dot_dimension_numbers<[1], [0], [0], [1], [0, 0, 1, 1], [], []>} : vector<8x128xbf16>, vector<128x512xbf16>, vector<8x512xf32> -> vector<8x512xf32>
    %313 = arith.addf %310, %312 : vector<8x512xf32>
    %314 = vector.extract_strided_slice %313 {offsets = [0, 0], sizes = [8, 128], strides = [1, 1]} : vector<8x512xf32> to vector<8x128xf32>
    %cst_107 = arith.constant 5.000000e-01 : f32
    %315 = vector.broadcast %cst_107 : f32 to vector<8x128xf32>
    %316 = arith.mulf %315, %314 : vector<8x128xf32>
    %317 = math.tanh %316 : vector<8x128xf32>
    %cst_108 = arith.constant 1.000000e+00 : f32
    %318 = vector.broadcast %cst_108 : f32 to vector<8x128xf32>
    %319 = arith.addf %317, %318 : vector<8x128xf32>
    %cst_109 = arith.constant 5.000000e-01 : f32
    %320 = vector.broadcast %cst_109 : f32 to vector<8x128xf32>
    %321 = arith.mulf %320, %319 : vector<8x128xf32>
    %322 = vector.extract_strided_slice %313 {offsets = [0, 128], sizes = [8, 128], strides = [1, 1]} : vector<8x512xf32> to vector<8x128xf32>
    %cst_110 = arith.constant 5.000000e-01 : f32
    %323 = vector.broadcast %cst_110 : f32 to vector<8x128xf32>
    %324 = arith.mulf %323, %322 : vector<8x128xf32>
    %325 = math.tanh %324 : vector<8x128xf32>
    %cst_111 = arith.constant 1.000000e+00 : f32
    %326 = vector.broadcast %cst_111 : f32 to vector<8x128xf32>
    %327 = arith.addf %325, %326 : vector<8x128xf32>
    %cst_112 = arith.constant 5.000000e-01 : f32
    %328 = vector.broadcast %cst_112 : f32 to vector<8x128xf32>
    %329 = arith.mulf %328, %327 : vector<8x128xf32>
    %330 = vector.extract_strided_slice %313 {offsets = [0, 256], sizes = [8, 128], strides = [1, 1]} : vector<8x512xf32> to vector<8x128xf32>
    %331 = math.tanh %330 : vector<8x128xf32>
    %332 = vector.extract_strided_slice %313 {offsets = [0, 384], sizes = [8, 128], strides = [1, 1]} : vector<8x512xf32> to vector<8x128xf32>
    %cst_113 = arith.constant 5.000000e-01 : f32
    %333 = vector.broadcast %cst_113 : f32 to vector<8x128xf32>
    %334 = arith.mulf %333, %332 : vector<8x128xf32>
    %335 = math.tanh %334 : vector<8x128xf32>
    %cst_114 = arith.constant 1.000000e+00 : f32
    %336 = vector.broadcast %cst_114 : f32 to vector<8x128xf32>
    %337 = arith.addf %335, %336 : vector<8x128xf32>
    %cst_115 = arith.constant 5.000000e-01 : f32
    %338 = vector.broadcast %cst_115 : f32 to vector<8x128xf32>
    %339 = arith.mulf %338, %337 : vector<8x128xf32>
    %340 = arith.mulf %329, %299 : vector<8x128xf32>
    %341 = arith.mulf %321, %331 : vector<8x128xf32>
    %342 = arith.addf %340, %341 : vector<8x128xf32>
    %343 = math.tanh %342 : vector<8x128xf32>
    %344 = arith.mulf %339, %343 : vector<8x128xf32>
    %345 = arith.truncf %344 : vector<8x128xf32> to vector<8x128xbf16>
    %346 = arith.index_cast %c7_i32 : i32 to index
    %c0_116 = arith.constant 0 : index
    %c0_117 = arith.constant 0 : index
    %347 = vector.load %arg4[%346, %c0_116, %c0_117] : memref<8x8x128xbf16, #tpu.memory_space<vmem>>, vector<1x8x128xbf16>
    %348 = vector.shape_cast %347 : vector<1x8x128xbf16> to vector<8x128xbf16>
    %349 = vector.shape_cast %345 : vector<8x128xbf16> to vector<1x8x128xbf16>
    tpu.vector_store %arg4[%346, %c0_116, %c0_117], %349 {strides = array<i32>} : memref<8x8x128xbf16, #tpu.memory_space<vmem>>, vector<1x8x128xbf16>,
    %c8_i32 = arith.constant 8 : i32
    %c0_118 = arith.constant 0 : index
    %c0_119 = arith.constant 0 : index
    %350 = vector.load %arg7[%c0_118, %c0_119] : memref<8x128xf32, #tpu.memory_space<vmem>>, vector<8x128xf32>
    tpu.vector_store %arg7[%c0_118, %c0_119], %344 {strides = array<i32>} : memref<8x128xf32, #tpu.memory_space<vmem>>, vector<8x128xf32>,
    %c0_120 = arith.constant 0 : index
    %c0_121 = arith.constant 0 : index
    %351 = vector.load %arg8[%c0_120, %c0_121] : memref<8x128xf32, #tpu.memory_space<vmem>>, vector<8x128xf32>
    tpu.vector_store %arg8[%c0_120, %c0_121], %342 {strides = array<i32>} : memref<8x128xf32, #tpu.memory_space<vmem>>, vector<8x128xf32>,
    return
  }
  func.func @transform_0(%arg0: i32, %arg1: i32) -> (i32, i32, i32) {
    %c0_i32 = arith.constant 0 : i32
    %c0_i32_0 = arith.constant 0 : i32
    return %arg1, %arg0, %c0_i32 : i32, i32, i32
  }
  func.func @transform_2(%arg0: i32, %arg1: i32) -> (i32, i32, i32) {
    %c0_i32 = arith.constant 0 : i32
    %c0_i32_0 = arith.constant 0 : i32
    return %arg1, %arg0, %c0_i32 : i32, i32, i32
  }
}

module attributes {stable_mosaic.version = 11 : i64} {
  func.func @_matmul_bias_kernel(%arg0: i32, %arg1: i32, %arg2: i32, %arg3: memref<32x128xbf16, #tpu.memory_space<vmem>>, %arg4: memref<128x128xbf16, #tpu.memory_space<vmem>>, %arg5: memref<1x128xf32, #tpu.memory_space<vmem>>, %arg6: memref<32x128xf32, #tpu.memory_space<vmem>>, %arg7: memref<32x128xf32, #tpu.memory_space<vmem>>) attributes {dimension_semantics = [#tpu.dimension_semantics<parallel>, #tpu.dimension_semantics<parallel>, #tpu.dimension_semantics<arbitrary>], iteration_bounds = array<i64: 1, 1, 1>, scalar_prefetch = 0 : i64, scratch_operands = 1 : i64, tpu.core_type = #tpu.core_type<tc>, window_params = [{transform_indices = @transform_0, window_bounds = array<i64: 32, 128>}, {transform_indices = @transform_1, window_bounds = array<i64: 128, 128>}, {transform_indices = @transform_2, window_bounds = array<i64: 1, 128>}, {transform_indices = @transform_3, window_bounds = array<i64: 32, 128>}]} {
    %c0_i32 = arith.constant 0 : i32
    %0 = arith.cmpi eq, %arg2, %c0_i32 : i32
    %1 = arith.extui %0 : i1 to i32
    %c0_i32_0 = arith.constant 0 : i32
    %2 = arith.cmpi ne, %1, %c0_i32_0 : i32
    scf.if %2 {
      %cst_10 = arith.constant 0.000000e+00 : f32
      %12 = vector.broadcast %cst_10 : f32 to vector<32x128xf32>
      %c0_11 = arith.constant 0 : index
      %c0_12 = arith.constant 0 : index
      %13 = vector.load %arg7[%c0_11, %c0_12] : memref<32x128xf32, #tpu.memory_space<vmem>>, vector<32x128xf32>
      tpu.vector_store %arg7[%c0_11, %c0_12], %12 {strides = array<i32>} : memref<32x128xf32, #tpu.memory_space<vmem>>, vector<32x128xf32>,
    } else {
    }
    %c0 = arith.constant 0 : index
    %c0_1 = arith.constant 0 : index
    %3 = vector.load %arg7[%c0, %c0_1] : memref<32x128xf32, #tpu.memory_space<vmem>>, vector<32x128xf32>
    %c0_2 = arith.constant 0 : index
    %c0_3 = arith.constant 0 : index
    %4 = vector.load %arg3[%c0_2, %c0_3] : memref<32x128xbf16, #tpu.memory_space<vmem>>, vector<32x128xbf16>
    %c0_4 = arith.constant 0 : index
    %c0_5 = arith.constant 0 : index
    %5 = vector.load %arg4[%c0_4, %c0_5] : memref<128x128xbf16, #tpu.memory_space<vmem>>, vector<128x128xbf16>
    %cst = arith.constant dense<0.000000e+00> : vector<32x128xf32>
    %6 = tpu.matmul %4, %5, %cst {dimension_numbers = #tpu.dot_dimension_numbers<[1], [0], [0], [1], [0, 0, 1, 1], [], []>} : vector<32x128xbf16>, vector<128x128xbf16>, vector<32x128xf32> -> vector<32x128xf32>
    %7 = arith.addf %3, %6 : vector<32x128xf32>
    %c0_6 = arith.constant 0 : index
    %c0_7 = arith.constant 0 : index
    %8 = vector.load %arg7[%c0_6, %c0_7] : memref<32x128xf32, #tpu.memory_space<vmem>>, vector<32x128xf32>
    tpu.vector_store %arg7[%c0_6, %c0_7], %7 {strides = array<i32>} : memref<32x128xf32, #tpu.memory_space<vmem>>, vector<32x128xf32>,
    %c0_i32_8 = arith.constant 0 : i32
    %9 = arith.cmpi eq, %arg2, %c0_i32_8 : i32
    %10 = arith.extui %9 : i1 to i32
    %c0_i32_9 = arith.constant 0 : i32
    %11 = arith.cmpi ne, %10, %c0_i32_9 : i32
    scf.if %11 {
      %c0_10 = arith.constant 0 : index
      %c0_11 = arith.constant 0 : index
      %12 = vector.load %arg7[%c0_10, %c0_11] : memref<32x128xf32, #tpu.memory_space<vmem>>, vector<32x128xf32>
      %c0_12 = arith.constant 0 : index
      %c0_13 = arith.constant 0 : index
      %13 = vector.load %arg5[%c0_12, %c0_13] : memref<1x128xf32, #tpu.memory_space<vmem>>, vector<1x128xf32>
      %14 = vector.broadcast %13 : vector<1x128xf32> to vector<32x128xf32>
      %15 = arith.addf %12, %14 : vector<32x128xf32>
      %c0_14 = arith.constant 0 : index
      %c0_15 = arith.constant 0 : index
      %16 = vector.load %arg6[%c0_14, %c0_15] : memref<32x128xf32, #tpu.memory_space<vmem>>, vector<32x128xf32>
      tpu.vector_store %arg6[%c0_14, %c0_15], %15 {strides = array<i32>} : memref<32x128xf32, #tpu.memory_space<vmem>>, vector<32x128xf32>,
    } else {
    }
    return
  }
  func.func @transform_0(%arg0: i32, %arg1: i32, %arg2: i32) -> (i32, i32) {
    %c0_i32 = arith.constant 0 : i32
    return %arg0, %arg2 : i32, i32
  }
  func.func @transform_1(%arg0: i32, %arg1: i32, %arg2: i32) -> (i32, i32) {
    %c0_i32 = arith.constant 0 : i32
    return %arg2, %arg1 : i32, i32
  }
  func.func @transform_2(%arg0: i32, %arg1: i32, %arg2: i32) -> (i32, i32) {
    %c0_i32 = arith.constant 0 : i32
    %c0_i32_0 = arith.constant 0 : i32
    return %c0_i32, %arg1 : i32, i32
  }
  func.func @transform_3(%arg0: i32, %arg1: i32, %arg2: i32) -> (i32, i32) {
    %c0_i32 = arith.constant 0 : i32
    return %arg0, %arg1 : i32, i32
  }
}

</mosaic_0001>

<bundles_post_ra>
// kernel: lstm_model_forward.9
= control target key start
LH: loop header
LB: loop body
LE: loop exit
PB: predicated region body
PF: predicated region fallthrough
CT: control target
= control target key end

     0   :  { %s349_s0 = inlined_call_operand.vmem [shape: bf16[32,128], index: 0, kind: input, shape index: {}]   ;;  %s350_s1 = inlined_call_operand.vmem [shape: bf16[128,128], index: 1, kind: input, shape index: {}]   ;;  %s351_s2 = inlined_call_operand.vmem [shape: f32[1,128], index: 2, kind: input, shape index: {}]   ;;  %s352_s3 = inlined_call_operand.hbm [shape: f32[32,128], index: 3, kind: output, shape index: {}]  }
   0x1   :  { %v247_v0 = vld [vmem:[%s350_s1] sm:$0xff]   ;;  %v248_v1 = vld [vmem:[%s350_s1 + $0x8] sm:$0xff]   ;;  %v249_v2 = vld [vmem:[%s350_s1 + $0x10] sm:$0xff]  }
   0x2   :  { %224 = vmatprep.subr.bf16.mxu0 %v247_v0  ;;  %v250_v3 = vld [vmem:[%s350_s1 + $0x18] sm:$0xff]   ;;  %v255_v4 = vld [vmem:[%s349_s0] sm:$0xff]  }
   0x3   :  { %225 = vmatpush3.bf16.msra.mxu0 %v247_v0  ;;  %240 = vmatprep.mubr.bf16.mxu0 %v255_v4 }
   0x4   :  { %226 = vmatprep.subr.bf16.mxu0 %v248_v1 }
   0x7   :  { %227 = vmatpush3.bf16.msra.mxu0 %v248_v1 }
   0x8   :  { %228 = vmatprep.subr.bf16.mxu0 %v249_v2 }
   0x9   :  { %8 = vsyncpa [#allocation4], 0  ;;  %v251_v5 = vld [vmem:[%s350_s1 + $0x20] sm:$0xff]   ;;  %v252_v6 = vld [vmem:[%s350_s1 + $0x28] sm:$0xff]   ;;  %s281_s7 = smov [#allocation3]  }
   0xa   :  { %v253_v7 = vld [vmem:[%s350_s1 + $0x30] sm:$0xff]   ;;  %v254_v8 = vld [vmem:[%s350_s1 + $0x38] sm:$0xff]   ;;  %v256_v9 = vld [vmem:[%s349_s0 + $0x8] sm:$0xff]   ;;  %s192_s8 = sshll.u32 %s281_s7, 4  ;;  %s193_s8 = int_to_ptr.vmem [resolvable:$true] %s192_s8 }
   0xb   :  { %229 = vmatpush3.bf16.msra.mxu0 %v249_v2  ;;  %v213_v10 = vld [vmem:[%s351_s2] ss:$0 sm:$0xff]  ;;  %s257_s0 = scalar_lea.vmem %s193_s8, 512  ;;  %p262_p1 = scmp.lt.s32.totalorder %s193_s8, %s193_s8 }
   0xc   :  { %230 = vmatprep.subr.bf16.mxu0 %v250_v3  ;;  %p258_p0 = scmp.ne.s32.totalorder %s193_s8, %s257_s0  ;;  %p263_p2 = scmp.lt.s32.totalorder %s257_s0, %s257_s0 }
   0xe   :  { %p264_p3 = por %p263_p2, %p262_p1 }
   0xf   :  { %231 = vmatpush3.bf16.msra.mxu0 %v250_v3 }
  0x10   :  { %232 = vmatprep.subr.bf16.mxu0 %v251_v5  ;;  %p265_p4 = pnand %p264_p3, %p258_p0 }
  0x13   :  { %233 = vmatpush3.bf16.msra.mxu0 %v251_v5 }
  0x14   :  { %234 = vmatprep.subr.bf16.mxu0 %v252_v6 }
  0x17   :  { %235 = vmatpush3.bf16.msra.mxu0 %v252_v6 }
  0x18   :  { %236 = vmatprep.subr.bf16.mxu0 %v253_v7 }
  0x1b   :  { %237 = vmatpush3.bf16.msra.mxu0 %v253_v7 }
  0x1c   :  { %238 = vmatprep.subr.bf16.mxu0 %v254_v8 }
  0x1f   :  { %239 = vmatpush3.bf16.msra.mxu0 %v254_v8 }
  0x22   :  { %241 = vmatmul.mubr.bf16.vlgmr.msra.gmra.mrb[0].mxu0 %v256_v9 }
  0xf5   :  { %v242_v11 = vpop.f32.mrb[0].mxu0 }
  0xf6   :  { %v181_v12 = vadd.f32 %v242_v11, %v213_v10  ;;  %v142_v13 = vpop.f32.mrb[1].mxu0 }
  0xf7   :  { %v179_v14 = vadd.f32 %v213_v10, %v142_v13  ;;  %v243_v15 = vpop.f32.mrb[2].mxu0 }
  0xf8   :  { %185 = vst [vmem:[#allocation3 + $0x10] sm:$0xff] %v181_v12  ;;  %v182_v16 = vadd.f32 %v243_v15, %v213_v10  ;;  %v145_v17 = vpop.f32.mrb[3].mxu0 }
  0xf9   :  { %183 = vst [vmem:[#allocation3] sm:$0xff] %v179_v14  ;;  %v180_v18 = vadd.f32 %v213_v10, %v145_v17 }
  0xfa   :  { %186 = vst [vmem:[#allocation3 + $0x18] sm:$0xff] %v182_v16 }
  0xfb   :  { %184 = vst [vmem:[#allocation3 + $0x8] sm:$0xff] %v180_v18 }
  0xfc   :  { %268 = shalt.err (!%p265_p4)
}
  0xfd   :  { %s269_s9 = scalar_lea.hbm %s352_s3, 512 }
  0xfe   :  { %p270_p5 = scmp.ne.s32.totalorder %s352_s3, %s269_s9  ;;  %p273_p6 = scmp.lt.u32.totalorder %s269_s9, %s352_s3 }
 0x100   :  { %p275_p7 = pnand %p273_p6, %p270_p5 }
 0x102   :  { %278 = shalt.err (!%p275_p7)
}
 0x103   :  { %s282_s14 = smov 128   ;;  %s283_s15 = smov 8  }
 0x104   :  { %198 = dma.vmem_to_hbm [thread:$0]  %s193_s8, 512, %s352_s3, [#allocation4], %s282_s14, %s282_s14, %s283_s15  }
 0x105   :  { %279 = dma.done.wait [#allocation4], 512  }
 0x106   :  { %280 = vsyncadd [#allocation4], 4294966784 }
 0x107   :  { %202 = vsyncpa [#allocation4], 1 }

// kernel: lstm_model_forward.5
= control target key start
LH: loop header
LB: loop body
LE: loop exit
PB: predicated region body
PF: predicated region fallthrough
CT: control target
= control target key end

     0   :  { %v815_v1 = vmov 0   ;;  %v534_v45 = vlaneseq  ;;  %s1055_s1 = inlined_call_operand.vmem [shape: bf16[128,512], index: 1, kind: input, shape index: {}]   ;;  %s1056_s0 = inlined_call_operand.vmem [shape: f32[64,128], index: 0, kind: input, shape index: {}]   ;;  %s1057_s2 = inlined_call_operand.vmem [shape: f32[1,512], index: 2, kind: input, shape index: {}]   ;;  %s1058_s3 = inlined_call_operand.vmem [shape: bf16[64,512], index: 3, kind: output, shape index: {}]  }
   0x1   :  { %v767_v0 = vld [vmem:[%s1055_s1 + $0x4] ss:$16 sps:$4 sm:$0xff]   ;;  %319 = vmatprep.mubr.bf16.mxu0 %v815_v1  ;;  %392 = vmatprep.mubr.bf16.mxu1 %v815_v1  ;;  %v769_v2 = vld [vmem:[%s1055_s1 + $0xc] ss:$16 sps:$4 sm:$0xff]   ;;  %v771_v3 = vld [vmem:[%s1055_s1] ss:$16 sps:$4 sm:$0xff]  }
   0x2   :  { %287 = vmatprep.subr.bf16.mxu0 %v767_v0  ;;  %v772_v4 = vld [vmem:[%s1055_s1 + $0x8] ss:$16 sps:$4 sm:$0xff]   ;;  %360 = vmatprep.subr.bf16.mxu1 %v769_v2  ;;  %v773_v5 = vld [vmem:[%s1055_s1 + $0x24] ss:$16 sps:$4 sm:$0xff]   ;;  %v775_v6 = vld [vmem:[%s1055_s1 + $0x2c] ss:$16 sps:$4 sm:$0xff]  }
   0x3   :  { %288 = vmatpush1.bf16.msra.mxu0 %v771_v3  ;;  %361 = vmatpush1.bf16.msra.mxu1 %v772_v4  ;;  %v777_v7 = vld [vmem:[%s1055_s1 + $0x20] ss:$16 sps:$4 sm:$0xff]   ;;  %v778_v8 = vld [vmem:[%s1055_s1 + $0x28] ss:$16 sps:$4 sm:$0xff]   ;;  %v779_v9 = vld [vmem:[%s1055_s1 + $0x44] ss:$16 sps:$4 sm:$0xff]  }
   0x4   :  { %289 = vmatprep.subr.bf16.mxu0 %v773_v5  ;;  %362 = vmatprep.subr.bf16.mxu1 %v775_v6  ;;  %v781_v10 = vld [vmem:[%s1055_s1 + $0x4c] ss:$16 sps:$4 sm:$0xff]   ;;  %v783_v11 = vld [vmem:[%s1055_s1 + $0x40] ss:$16 sps:$4 sm:$0xff]   ;;  %v784_v12 = vld [vmem:[%s1055_s1 + $0x48] ss:$16 sps:$4 sm:$0xff]  }
   0x5   :  { %v785_v13 = vld [vmem:[%s1055_s1 + $0x64] ss:$16 sps:$4 sm:$0xff]   ;;  %v787_v14 = vld [vmem:[%s1055_s1 + $0x6c] ss:$16 sps:$4 sm:$0xff]   ;;  %v789_v15 = vld [vmem:[%s1055_s1 + $0x60] ss:$16 sps:$4 sm:$0xff]  }
   0x6   :  { %v790_v16 = vld [vmem:[%s1055_s1 + $0x68] ss:$16 sps:$4 sm:$0xff]   ;;  %v791_v17 = vld [vmem:[%s1055_s1 + $0x84] ss:$16 sps:$4 sm:$0xff]   ;;  %v793_v18 = vld [vmem:[%s1055_s1 + $0x8c] ss:$16 sps:$4 sm:$0xff]  }
   0x7   :  { %290 = vmatpush1.bf16.msra.mxu0 %v777_v7  ;;  %363 = vmatpush1.bf16.msra.mxu1 %v778_v8  ;;  %v795_v19 = vld [vmem:[%s1055_s1 + $0x80] ss:$16 sps:$4 sm:$0xff]   ;;  %v796_v20 = vld [vmem:[%s1055_s1 + $0x88] ss:$16 sps:$4 sm:$0xff]   ;;  %v797_v21 = vld [vmem:[%s1055_s1 + $0xa4] ss:$16 sps:$4 sm:$0xff]  }
   0x8   :  { %291 = vmatprep.subr.bf16.mxu0 %v779_v9  ;;  %364 = vmatprep.subr.bf16.mxu1 %v781_v10  ;;  %v799_v22 = vld [vmem:[%s1055_s1 + $0xac] ss:$16 sps:$4 sm:$0xff]   ;;  %v801_v23 = vld [vmem:[%s1055_s1 + $0xa0] ss:$16 sps:$4 sm:$0xff]   ;;  %v802_v24 = vld [vmem:[%s1055_s1 + $0xa8] ss:$16 sps:$4 sm:$0xff]  }
   0x9   :  { %v803_v25 = vld [vmem:[%s1055_s1 + $0xc4] ss:$16 sps:$4 sm:$0xff]   ;;  %v805_v26 = vld [vmem:[%s1055_s1 + $0xcc] ss:$16 sps:$4 sm:$0xff]   ;;  %v807_v27 = vld [vmem:[%s1055_s1 + $0xc0] ss:$16 sps:$4 sm:$0xff]  }
   0xa   :  { %v808_v28 = vld [vmem:[%s1055_s1 + $0xc8] ss:$16 sps:$4 sm:$0xff]   ;;  %v809_v29 = vld [vmem:[%s1055_s1 + $0xe4] ss:$16 sps:$4 sm:$0xff]   ;;  %v811_v30 = vld [vmem:[%s1055_s1 + $0xec] ss:$16 sps:$4 sm:$0xff]  }
   0xb   :  { %292 = vmatpush1.bf16.msra.mxu0 %v783_v11  ;;  %365 = vmatpush1.bf16.msra.mxu1 %v784_v12  ;;  %v813_v31 = vld [vmem:[%s1055_s1 + $0xe0] ss:$16 sps:$4 sm:$0xff]   ;;  %v814_v32 = vld [vmem:[%s1055_s1 + $0xe8] ss:$16 sps:$4 sm:$0xff]   ;;  %v535_v46 = vshrl.u32 %v534_v45, 7 }
   0xc   :  { %293 = vmatprep.subr.bf16.mxu0 %v785_v13  ;;  %366 = vmatprep.subr.bf16.mxu1 %v787_v14  ;;  %v83_v33 = vld [vmem:[%s1056_s0] sm:$0xff]  ;;  %v84_v34 = vld [vmem:[%s1056_s0 + $0x8] sm:$0xff]  ;;  %v85_v36 = vld [vmem:[%s1056_s0 + $0x10] sm:$0xff] }
   0xd   :  { %v91_v35 = vpack.c.bf16 %v84_v34, %v83_v33  ;;  %v86_v37 = vld [vmem:[%s1056_s0 + $0x18] sm:$0xff]  ;;  %v87_v39 = vld [vmem:[%s1056_s0 + $0x20] sm:$0xff]  ;;  %v88_v40 = vld [vmem:[%s1056_s0 + $0x28] sm:$0xff]  ;;  %v536_v47 = vsub.s32 0, %v535_v46  ;;  %v544_v48 = vsub.s32 2, %v535_v46  ;;  %v540_v50 = vsub.s32 1, %v535_v46 }
   0xe   :  { %v92_v38 = vpack.c.bf16 %v86_v37, %v85_v36  ;;  %v93_v41 = vpack.c.bf16 %v88_v40, %v87_v39  ;;  %v89_v42 = vld [vmem:[%s1056_s0 + $0x30] sm:$0xff]  ;;  %v90_v43 = vld [vmem:[%s1056_s0 + $0x38] sm:$0xff]  ;;  %v532_v49 = vld [vmem:[%s1057_s2] sm:$0xf]  ;;  %v548_v51 = vsub.s32 3, %v535_v46 }
   0xf   :  { %294 = vmatpush1.bf16.msra.mxu0 %v789_v15  ;;  %367 = vmatpush1.bf16.msra.mxu1 %v790_v16  ;;  %v94_v44 = vpack.c.bf16 %v90_v43, %v89_v42  ;;  %v967_v52 = vrot.slane %v532_v49, %v536_v47  ;;  %v969_v53 = vrot.slane %v532_v49, %v544_v48 }
  0x10   :  { %295 = vmatprep.subr.bf16.mxu0 %v791_v17  ;;  %368 = vmatprep.subr.bf16.mxu1 %v793_v18  ;;  %v971_v54 = vrot.slane %v532_v49, %v540_v50  ;;  %v973_v55 = vrot.slane %v532_v49, %v548_v51 }
  0x13   :  { %296 = vmatpush1.bf16.msra.mxu0 %v795_v19  ;;  %369 = vmatpush1.bf16.msra.mxu1 %v796_v20 }
  0x14   :  { %297 = vmatprep.subr.bf16.mxu0 %v797_v21  ;;  %370 = vmatprep.subr.bf16.mxu1 %v799_v22 }
  0x17   :  { %298 = vmatpush1.bf16.msra.mxu0 %v801_v23  ;;  %371 = vmatpush1.bf16.msra.mxu1 %v802_v24 }
  0x18   :  { %299 = vmatprep.subr.bf16.mxu0 %v803_v25  ;;  %372 = vmatprep.subr.bf16.mxu1 %v805_v26 }
  0x1b   :  { %300 = vmatpush1.bf16.msra.mxu0 %v807_v27  ;;  %373 = vmatpush1.bf16.msra.mxu1 %v808_v28 }
  0x1c   :  { %301 = vmatprep.subr.bf16.mxu0 %v809_v29  ;;  %374 = vmatprep.subr.bf16.mxu1 %v811_v30 }
  0x1f   :  { %302 = vmatpush1.bf16.msra.mxu0 %v813_v31  ;;  %375 = vmatpush1.bf16.msra.mxu1 %v814_v32 }
  0x22   :  { %320 = vmatmul.mubr.bf16.vlgmr.msra.gmra.mrb[0].mxu0 %v91_v35  ;;  %393 = vmatmul.mubr.bf16.vlgmr.msra.gmra.mrb[0].mxu1 %v91_v35 }
  0x23   :  { %329 = vmatprep.mubr.bf16.mxu0 %v815_v1  ;;  %402 = vmatprep.mubr.bf16.mxu1 %v815_v1 }
  0x2a   :  { %330 = vmatmul.mubr.bf16.gmra.mrb[4].mxu0 %v92_v38  ;;  %403 = vmatmul.mubr.bf16.gmra.mrb[4].mxu1 %v92_v38 }
  0x2b   :  { %339 = vmatprep.mubr.bf16.mxu0 %v815_v1  ;;  %412 = vmatprep.mubr.bf16.mxu1 %v815_v1 }
  0x32   :  { %340 = vmatmul.mubr.bf16.gmra.mrb[8].mxu0 %v93_v41  ;;  %413 = vmatmul.mubr.bf16.gmra.mrb[8].mxu1 %v93_v41 }
  0x33   :  { %349 = vmatprep.mubr.bf16.mxu0 %v815_v1  ;;  %422 = vmatprep.mubr.bf16.mxu1 %v815_v1 }
  0x3a   :  { %350 = vmatmul.mubr.bf16.gmra.mrb[12].mxu0 %v94_v44  ;;  %423 = vmatmul.mubr.bf16.gmra.mrb[12].mxu1 %v94_v44 }
  0xf5   :  { %v321_v56 = vpop.f32.mrb[0].mxu0  ;;  %v394_v57 = vpop.f32.mrb[0].mxu1 }
  0xf6   :  { %v554_v58 = vadd.f32 %v967_v52, %v321_v56  ;;  %v556_v59 = vadd.f32 %v969_v53, %v394_v57  ;;  %v323_v60 = vpop.f32.mrb[1].mxu0  ;;  %v396_v61 = vpop.f32.mrb[1].mxu1 }
  0xf7   :  { %v555_v62 = vadd.f32 %v971_v54, %v323_v60  ;;  %v557_v63 = vadd.f32 %v973_v55, %v396_v61  ;;  %v325_v0 = vpop.f32.mrb[2].mxu0  ;;  %v398_v1 = vpop.f32.mrb[2].mxu1 }
  0xf8   :  { %v558_v2 = vadd.f32 %v967_v52, %v325_v0  ;;  %v560_v3 = vadd.f32 %v969_v53, %v398_v1  ;;  %v327_v4 = vpop.f32.mrb[3].mxu0  ;;  %v400_v5 = vpop.f32.mrb[3].mxu1 }
  0xf9   :  { %v750_v6 = vpack.c.bf16 %v555_v62, %v554_v58  ;;  %v751_v7 = vpack.c.bf16 %v557_v63, %v556_v59  ;;  %v559_v8 = vadd.f32 %v971_v54, %v327_v4  ;;  %v561_v9 = vadd.f32 %v973_v55, %v400_v5 }
  0xfb   :  { %682 = vst [vmem:[%s1058_s3] sm:$0xff] %v750_v6  ;;  %683 = vst [vmem:[%s1058_s3 + $0x8] sm:$0xff] %v751_v7  ;;  %v752_v10 = vpack.c.bf16 %v559_v8, %v558_v2  ;;  %v753_v11 = vpack.c.bf16 %v561_v9, %v560_v3 }
  0xfd   :  { %684 = vst [vmem:[%s1058_s3 + $0x10] sm:$0xff] %v752_v10  ;;  %685 = vst [vmem:[%s1058_s3 + $0x18] sm:$0xff] %v753_v11  ;;  %v331_v12 = vpop.f32.mrb[4].mxu0  ;;  %v404_v13 = vpop.f32.mrb[4].mxu1 }
  0xfe   :  { %v562_v14 = vadd.f32 %v967_v52, %v331_v12  ;;  %v564_v15 = vadd.f32 %v969_v53, %v404_v13  ;;  %v333_v16 = vpop.f32.mrb[5].mxu0  ;;  %v406_v17 = vpop.f32.mrb[5].mxu1 }
  0xff   :  { %v563_v18 = vadd.f32 %v971_v54, %v333_v16  ;;  %v565_v19 = vadd.f32 %v973_v55, %v406_v17  ;;  %v335_v20 = vpop.f32.mrb[6].mxu0  ;;  %v408_v21 = vpop.f32.mrb[6].mxu1 }
 0x100   :  { %v566_v22 = vadd.f32 %v967_v52, %v335_v20  ;;  %v568_v23 = vadd.f32 %v969_v53, %v408_v21  ;;  %v337_v24 = vpop.f32.mrb[7].mxu0  ;;  %v410_v25 = vpop.f32.mrb[7].mxu1 }
 0x101   :  { %v754_v26 = vpack.c.bf16 %v563_v18, %v562_v14  ;;  %v755_v27 = vpack.c.bf16 %v565_v19, %v564_v15  ;;  %v567_v28 = vadd.f32 %v971_v54, %v337_v24  ;;  %v569_v29 = vadd.f32 %v973_v55, %v410_v25 }
 0x103   :  { %686 = vst [vmem:[%s1058_s3 + $0x20] sm:$0xff] %v754_v26  ;;  %687 = vst [vmem:[%s1058_s3 + $0x28] sm:$0xff] %v755_v27  ;;  %v756_v30 = vpack.c.bf16 %v567_v28, %v566_v22  ;;  %v757_v31 = vpack.c.bf16 %v569_v29, %v568_v23 }
 0x105   :  { %688 = vst [vmem:[%s1058_s3 + $0x30] sm:$0xff] %v756_v30  ;;  %689 = vst [vmem:[%s1058_s3 + $0x38] sm:$0xff] %v757_v31  ;;  %v341_v32 = vpop.f32.mrb[8].mxu0  ;;  %v414_v33 = vpop.f32.mrb[8].mxu1 }
 0x106   :  { %v570_v34 = vadd.f32 %v967_v52, %v341_v32  ;;  %v572_v35 = vadd.f32 %v969_v53, %v414_v33  ;;  %v343_v36 = vpop.f32.mrb[9].mxu0  ;;  %v416_v37 = vpop.f32.mrb[9].mxu1 }
 0x107   :  { %v571_v38 = vadd.f32 %v971_v54, %v343_v36  ;;  %v573_v39 = vadd.f32 %v973_v55, %v416_v37  ;;  %v345_v40 = vpop.f32.mrb[10].mxu0  ;;  %v418_v41 = vpop.f32.mrb[10].mxu1 }
 0x108   :  { %v574_v42 = vadd.f32 %v967_v52, %v345_v40  ;;  %v576_v43 = vadd.f32 %v969_v53, %v418_v41  ;;  %v347_v44 = vpop.f32.mrb[11].mxu0  ;;  %v420_v45 = vpop.f32.mrb[11].mxu1 }
 0x109   :  { %v758_v46 = vpack.c.bf16 %v571_v38, %v570_v34  ;;  %v759_v47 = vpack.c.bf16 %v573_v39, %v572_v35  ;;  %v575_v48 = vadd.f32 %v971_v54, %v347_v44  ;;  %v577_v49 = vadd.f32 %v973_v55, %v420_v45 }
 0x10b   :  { %690 = vst [vmem:[%s1058_s3 + $0x40] sm:$0xff] %v758_v46  ;;  %691 = vst [vmem:[%s1058_s3 + $0x48] sm:$0xff] %v759_v47  ;;  %v760_v50 = vpack.c.bf16 %v575_v48, %v574_v42  ;;  %v761_v51 = vpack.c.bf16 %v577_v49, %v576_v43 }
 0x10d   :  { %692 = vst [vmem:[%s1058_s3 + $0x50] sm:$0xff] %v760_v50  ;;  %693 = vst [vmem:[%s1058_s3 + $0x58] sm:$0xff] %v761_v51  ;;  %v351_v56 = vpop.f32.mrb[12].mxu0  ;;  %v424_v57 = vpop.f32.mrb[12].mxu1 }
 0x10e   :  { %v578_v58 = vadd.f32 %v967_v52, %v351_v56  ;;  %v580_v59 = vadd.f32 %v969_v53, %v424_v57  ;;  %v353_v60 = vpop.f32.mrb[13].mxu0  ;;  %v426_v61 = vpop.f32.mrb[13].mxu1 }
 0x10f   :  { %v579_v62 = vadd.f32 %v971_v54, %v353_v60  ;;  %v581_v63 = vadd.f32 %v973_v55, %v426_v61  ;;  %v355_v0 = vpop.f32.mrb[14].mxu0  ;;  %v428_v1 = vpop.f32.mrb[14].mxu1 }
 0x110   :  { %v582_v2 = vadd.f32 %v967_v52, %v355_v0  ;;  %v584_v3 = vadd.f32 %v969_v53, %v428_v1  ;;  %v357_v4 = vpop.f32.mrb[15].mxu0  ;;  %v430_v5 = vpop.f32.mrb[15].mxu1 }
 0x111   :  { %v762_v6 = vpack.c.bf16 %v579_v62, %v578_v58  ;;  %v763_v7 = vpack.c.bf16 %v581_v63, %v580_v59  ;;  %v583_v8 = vadd.f32 %v971_v54, %v357_v4  ;;  %v585_v9 = vadd.f32 %v973_v55, %v430_v5 }
 0x113   :  { %694 = vst [vmem:[%s1058_s3 + $0x60] sm:$0xff] %v762_v6  ;;  %695 = vst [vmem:[%s1058_s3 + $0x68] sm:$0xff] %v763_v7  ;;  %v764_v10 = vpack.c.bf16 %v583_v8, %v582_v2  ;;  %v765_v52 = vpack.c.bf16 %v585_v9, %v584_v3 }
 0x115   :  { %696 = vst [vmem:[%s1058_s3 + $0x70] sm:$0xff] %v764_v10  ;;  %697 = vst [vmem:[%s1058_s3 + $0x78] sm:$0xff] %v765_v52 }

// kernel: lstm_model_forward.7
= control target key start
LH: loop header
LB: loop body
LE: loop exit
PB: predicated region body
PF: predicated region fallthrough
CT: control target
= control target key end

     0   :  { %v843_v1 = vmov 0   ;;  %v554_v37 = vlaneseq  ;;  %s1071_s1 = inlined_call_operand.vmem [shape: bf16[128,512], index: 1, kind: input, shape index: {}]   ;;  %s1072_s0 = inlined_call_operand.vmem [shape: bf16[64,128], index: 0, kind: input, shape index: {}]   ;;  %s1073_s2 = inlined_call_operand.vmem [shape: f32[1,512], index: 2, kind: input, shape index: {}]   ;;  %s1074_s3 = inlined_call_operand.vmem [shape: bf16[64,512], index: 3, kind: output, shape index: {}]  }
   0x1   :  { %v791_v0 = vld [vmem:[%s1071_s1 + $0x4] ss:$16 sps:$4 sm:$0xff]   ;;  %339 = vmatprep.mubr.bf16.mxu0 %v843_v1  ;;  %412 = vmatprep.mubr.bf16.mxu1 %v843_v1  ;;  %v793_v2 = vld [vmem:[%s1071_s1 + $0xc] ss:$16 sps:$4 sm:$0xff]   ;;  %v795_v3 = vld [vmem:[%s1071_s1] ss:$16 sps:$4 sm:$0xff]  }
   0x2   :  { %307 = vmatprep.subr.bf16.mxu0 %v791_v0  ;;  %v796_v4 = vld [vmem:[%s1071_s1 + $0x8] ss:$16 sps:$4 sm:$0xff]   ;;  %380 = vmatprep.subr.bf16.mxu1 %v793_v2  ;;  %v797_v5 = vld [vmem:[%s1071_s1 + $0x24] ss:$16 sps:$4 sm:$0xff]   ;;  %v799_v6 = vld [vmem:[%s1071_s1 + $0x2c] ss:$16 sps:$4 sm:$0xff]  }
   0x3   :  { %308 = vmatpush1.bf16.msra.mxu0 %v795_v3  ;;  %381 = vmatpush1.bf16.msra.mxu1 %v796_v4  ;;  %v801_v7 = vld [vmem:[%s1071_s1 + $0x20] ss:$16 sps:$4 sm:$0xff]   ;;  %v802_v8 = vld [vmem:[%s1071_s1 + $0x28] ss:$16 sps:$4 sm:$0xff]   ;;  %v803_v9 = vld [vmem:[%s1071_s1 + $0x44] ss:$16 sps:$4 sm:$0xff]  }
   0x4   :  { %309 = vmatprep.subr.bf16.mxu0 %v797_v5  ;;  %382 = vmatprep.subr.bf16.mxu1 %v799_v6  ;;  %v805_v10 = vld [vmem:[%s1071_s1 + $0x4c] ss:$16 sps:$4 sm:$0xff]   ;;  %v807_v11 = vld [vmem:[%s1071_s1 + $0x40] ss:$16 sps:$4 sm:$0xff]   ;;  %v808_v12 = vld [vmem:[%s1071_s1 + $0x48] ss:$16 sps:$4 sm:$0xff]  }
   0x5   :  { %v809_v13 = vld [vmem:[%s1071_s1 + $0x64] ss:$16 sps:$4 sm:$0xff]   ;;  %v811_v14 = vld [vmem:[%s1071_s1 + $0x6c] ss:$16 sps:$4 sm:$0xff]   ;;  %v813_v15 = vld [vmem:[%s1071_s1 + $0x60] ss:$16 sps:$4 sm:$0xff]  }
   0x6   :  { %v814_v16 = vld [vmem:[%s1071_s1 + $0x68] ss:$16 sps:$4 sm:$0xff]   ;;  %v815_v17 = vld [vmem:[%s1071_s1 + $0x84] ss:$16 sps:$4 sm:$0xff]   ;;  %v817_v18 = vld [vmem:[%s1071_s1 + $0x8c] ss:$16 sps:$4 sm:$0xff]  }
   0x7   :  { %310 = vmatpush1.bf16.msra.mxu0 %v801_v7  ;;  %383 = vmatpush1.bf16.msra.mxu1 %v802_v8  ;;  %v819_v19 = vld [vmem:[%s1071_s1 + $0x80] ss:$16 sps:$4 sm:$0xff]   ;;  %v820_v20 = vld [vmem:[%s1071_s1 + $0x88] ss:$16 sps:$4 sm:$0xff]   ;;  %v821_v21 = vld [vmem:[%s1071_s1 + $0xa4] ss:$16 sps:$4 sm:$0xff]  }
   0x8   :  { %311 = vmatprep.subr.bf16.mxu0 %v803_v9  ;;  %384 = vmatprep.subr.bf16.mxu1 %v805_v10  ;;  %v823_v22 = vld [vmem:[%s1071_s1 + $0xac] ss:$16 sps:$4 sm:$0xff]   ;;  %v825_v23 = vld [vmem:[%s1071_s1 + $0xa0] ss:$16 sps:$4 sm:$0xff]   ;;  %v826_v24 = vld [vmem:[%s1071_s1 + $0xa8] ss:$16 sps:$4 sm:$0xff]  }
   0x9   :  { %v827_v25 = vld [vmem:[%s1071_s1 + $0xc4] ss:$16 sps:$4 sm:$0xff]   ;;  %v829_v26 = vld [vmem:[%s1071_s1 + $0xcc] ss:$16 sps:$4 sm:$0xff]   ;;  %v831_v27 = vld [vmem:[%s1071_s1 + $0xc0] ss:$16 sps:$4 sm:$0xff]  }
   0xa   :  { %v832_v28 = vld [vmem:[%s1071_s1 + $0xc8] ss:$16 sps:$4 sm:$0xff]   ;;  %v833_v29 = vld [vmem:[%s1071_s1 + $0xe4] ss:$16 sps:$4 sm:$0xff]   ;;  %v835_v30 = vld [vmem:[%s1071_s1 + $0xec] ss:$16 sps:$4 sm:$0xff]  }
   0xb   :  { %312 = vmatpush1.bf16.msra.mxu0 %v807_v11  ;;  %385 = vmatpush1.bf16.msra.mxu1 %v808_v12  ;;  %v837_v31 = vld [vmem:[%s1071_s1 + $0xe0] ss:$16 sps:$4 sm:$0xff]   ;;  %v838_v32 = vld [vmem:[%s1071_s1 + $0xe8] ss:$16 sps:$4 sm:$0xff]   ;;  %v555_v38 = vshrl.u32 %v554_v37, 7 }
   0xc   :  { %313 = vmatprep.subr.bf16.mxu0 %v809_v13  ;;  %386 = vmatprep.subr.bf16.mxu1 %v811_v14  ;;  %v839_v33 = vld [vmem:[%s1072_s0] sm:$0xff]   ;;  %v840_v34 = vld [vmem:[%s1072_s0 + $0x8] sm:$0xff]   ;;  %v841_v35 = vld [vmem:[%s1072_s0 + $0x10] sm:$0xff]  }
   0xd   :  { %v842_v36 = vld [vmem:[%s1072_s0 + $0x18] sm:$0xff]   ;;  %v556_v39 = vsub.s32 0, %v555_v38  ;;  %v564_v40 = vsub.s32 2, %v555_v38  ;;  %v552_v41 = vld [vmem:[%s1073_s2] sm:$0xf]  ;;  %v560_v42 = vsub.s32 1, %v555_v38 }
   0xe   :  { %v568_v43 = vsub.s32 3, %v555_v38 }
   0xf   :  { %314 = vmatpush1.bf16.msra.mxu0 %v813_v15  ;;  %387 = vmatpush1.bf16.msra.mxu1 %v814_v16  ;;  %v983_v44 = vrot.slane %v552_v41, %v556_v39  ;;  %v985_v45 = vrot.slane %v552_v41, %v564_v40  ;;  %v987_v46 = vrot.slane %v552_v41, %v560_v42 }
  0x10   :  { %315 = vmatprep.subr.bf16.mxu0 %v815_v17  ;;  %388 = vmatprep.subr.bf16.mxu1 %v817_v18  ;;  %v989_v47 = vrot.slane %v552_v41, %v568_v43 }
  0x13   :  { %316 = vmatpush1.bf16.msra.mxu0 %v819_v19  ;;  %389 = vmatpush1.bf16.msra.mxu1 %v820_v20 }
  0x14   :  { %317 = vmatprep.subr.bf16.mxu0 %v821_v21  ;;  %390 = vmatprep.subr.bf16.mxu1 %v823_v22 }
  0x17   :  { %318 = vmatpush1.bf16.msra.mxu0 %v825_v23  ;;  %391 = vmatpush1.bf16.msra.mxu1 %v826_v24 }
  0x18   :  { %319 = vmatprep.subr.bf16.mxu0 %v827_v25  ;;  %392 = vmatprep.subr.bf16.mxu1 %v829_v26 }
  0x1b   :  { %320 = vmatpush1.bf16.msra.mxu0 %v831_v27  ;;  %393 = vmatpush1.bf16.msra.mxu1 %v832_v28 }
  0x1c   :  { %321 = vmatprep.subr.bf16.mxu0 %v833_v29  ;;  %394 = vmatprep.subr.bf16.mxu1 %v835_v30 }
  0x1f   :  { %322 = vmatpush1.bf16.msra.mxu0 %v837_v31  ;;  %395 = vmatpush1.bf16.msra.mxu1 %v838_v32 }
  0x22   :  { %340 = vmatmul.mubr.bf16.vlgmr.msra.gmra.mrb[0].mxu0 %v839_v33  ;;  %413 = vmatmul.mubr.bf16.vlgmr.msra.gmra.mrb[0].mxu1 %v839_v33 }
  0x23   :  { %349 = vmatprep.mubr.bf16.mxu0 %v843_v1  ;;  %422 = vmatprep.mubr.bf16.mxu1 %v843_v1 }
  0x2a   :  { %350 = vmatmul.mubr.bf16.gmra.mrb[4].mxu0 %v840_v34  ;;  %423 = vmatmul.mubr.bf16.gmra.mrb[4].mxu1 %v840_v34 }
  0x2b   :  { %359 = vmatprep.mubr.bf16.mxu0 %v843_v1  ;;  %432 = vmatprep.mubr.bf16.mxu1 %v843_v1 }
  0x32   :  { %360 = vmatmul.mubr.bf16.gmra.mrb[8].mxu0 %v841_v35  ;;  %433 = vmatmul.mubr.bf16.gmra.mrb[8].mxu1 %v841_v35 }
  0x33   :  { %369 = vmatprep.mubr.bf16.mxu0 %v843_v1  ;;  %442 = vmatprep.mubr.bf16.mxu1 %v843_v1 }
  0x3a   :  { %370 = vmatmul.mubr.bf16.gmra.mrb[12].mxu0 %v842_v36  ;;  %443 = vmatmul.mubr.bf16.gmra.mrb[12].mxu1 %v842_v36 }
  0xf5   :  { %v341_v48 = vpop.f32.mrb[0].mxu0  ;;  %v414_v49 = vpop.f32.mrb[0].mxu1 }
  0xf6   :  { %v574_v50 = vadd.f32 %v983_v44, %v341_v48  ;;  %v576_v51 = vadd.f32 %v985_v45, %v414_v49  ;;  %v343_v52 = vpop.f32.mrb[1].mxu0  ;;  %v416_v53 = vpop.f32.mrb[1].mxu1 }
  0xf7   :  { %v575_v54 = vadd.f32 %v987_v46, %v343_v52  ;;  %v577_v55 = vadd.f32 %v989_v47, %v416_v53  ;;  %v345_v56 = vpop.f32.mrb[2].mxu0  ;;  %v418_v57 = vpop.f32.mrb[2].mxu1 }
  0xf8   :  { %v578_v58 = vadd.f32 %v983_v44, %v345_v56  ;;  %v580_v59 = vadd.f32 %v985_v45, %v418_v57  ;;  %v347_v60 = vpop.f32.mrb[3].mxu0  ;;  %v420_v61 = vpop.f32.mrb[3].mxu1 }
  0xf9   :  { %v774_v62 = vpack.c.bf16 %v575_v54, %v574_v50  ;;  %v775_v63 = vpack.c.bf16 %v577_v55, %v576_v51  ;;  %v579_v0 = vadd.f32 %v987_v46, %v347_v60  ;;  %v581_v1 = vadd.f32 %v989_v47, %v420_v61 }
  0xfb   :  { %702 = vst [vmem:[%s1074_s3] sm:$0xff] %v774_v62  ;;  %703 = vst [vmem:[%s1074_s3 + $0x8] sm:$0xff] %v775_v63  ;;  %v776_v2 = vpack.c.bf16 %v579_v0, %v578_v58  ;;  %v777_v3 = vpack.c.bf16 %v581_v1, %v580_v59 }
  0xfd   :  { %704 = vst [vmem:[%s1074_s3 + $0x10] sm:$0xff] %v776_v2  ;;  %705 = vst [vmem:[%s1074_s3 + $0x18] sm:$0xff] %v777_v3  ;;  %v351_v4 = vpop.f32.mrb[4].mxu0  ;;  %v424_v5 = vpop.f32.mrb[4].mxu1 }
  0xfe   :  { %v582_v6 = vadd.f32 %v983_v44, %v351_v4  ;;  %v584_v7 = vadd.f32 %v985_v45, %v424_v5  ;;  %v353_v8 = vpop.f32.mrb[5].mxu0  ;;  %v426_v9 = vpop.f32.mrb[5].mxu1 }
  0xff   :  { %v583_v10 = vadd.f32 %v987_v46, %v353_v8  ;;  %v585_v11 = vadd.f32 %v989_v47, %v426_v9  ;;  %v355_v12 = vpop.f32.mrb[6].mxu0  ;;  %v428_v13 = vpop.f32.mrb[6].mxu1 }
 0x100   :  { %v586_v14 = vadd.f32 %v983_v44, %v355_v12  ;;  %v588_v15 = vadd.f32 %v985_v45, %v428_v13  ;;  %v357_v16 = vpop.f32.mrb[7].mxu0  ;;  %v430_v17 = vpop.f32.mrb[7].mxu1 }
 0x101   :  { %v778_v18 = vpack.c.bf16 %v583_v10, %v582_v6  ;;  %v779_v19 = vpack.c.bf16 %v585_v11, %v584_v7  ;;  %v587_v20 = vadd.f32 %v987_v46, %v357_v16  ;;  %v589_v21 = vadd.f32 %v989_v47, %v430_v17 }
 0x103   :  { %706 = vst [vmem:[%s1074_s3 + $0x20] sm:$0xff] %v778_v18  ;;  %707 = vst [vmem:[%s1074_s3 + $0x28] sm:$0xff] %v779_v19  ;;  %v780_v22 = vpack.c.bf16 %v587_v20, %v586_v14  ;;  %v781_v23 = vpack.c.bf16 %v589_v21, %v588_v15 }
 0x105   :  { %708 = vst [vmem:[%s1074_s3 + $0x30] sm:$0xff] %v780_v22  ;;  %709 = vst [vmem:[%s1074_s3 + $0x38] sm:$0xff] %v781_v23  ;;  %v361_v24 = vpop.f32.mrb[8].mxu0  ;;  %v434_v25 = vpop.f32.mrb[8].mxu1 }
 0x106   :  { %v590_v26 = vadd.f32 %v983_v44, %v361_v24  ;;  %v592_v27 = vadd.f32 %v985_v45, %v434_v25  ;;  %v363_v28 = vpop.f32.mrb[9].mxu0  ;;  %v436_v29 = vpop.f32.mrb[9].mxu1 }
 0x107   :  { %v591_v30 = vadd.f32 %v987_v46, %v363_v28  ;;  %v593_v31 = vadd.f32 %v989_v47, %v436_v29  ;;  %v365_v32 = vpop.f32.mrb[10].mxu0  ;;  %v438_v33 = vpop.f32.mrb[10].mxu1 }
 0x108   :  { %v594_v34 = vadd.f32 %v983_v44, %v365_v32  ;;  %v596_v35 = vadd.f32 %v985_v45, %v438_v33  ;;  %v367_v36 = vpop.f32.mrb[11].mxu0  ;;  %v440_v37 = vpop.f32.mrb[11].mxu1 }
 0x109   :  { %v782_v38 = vpack.c.bf16 %v591_v30, %v590_v26  ;;  %v783_v39 = vpack.c.bf16 %v593_v31, %v592_v27  ;;  %v595_v40 = vadd.f32 %v987_v46, %v367_v36  ;;  %v597_v41 = vadd.f32 %v989_v47, %v440_v37 }
 0x10b   :  { %710 = vst [vmem:[%s1074_s3 + $0x40] sm:$0xff] %v782_v38  ;;  %711 = vst [vmem:[%s1074_s3 + $0x48] sm:$0xff] %v783_v39  ;;  %v784_v42 = vpack.c.bf16 %v595_v40, %v594_v34  ;;  %v785_v43 = vpack.c.bf16 %v597_v41, %v596_v35 }
 0x10d   :  { %712 = vst [vmem:[%s1074_s3 + $0x50] sm:$0xff] %v784_v42  ;;  %713 = vst [vmem:[%s1074_s3 + $0x58] sm:$0xff] %v785_v43  ;;  %v371_v48 = vpop.f32.mrb[12].mxu0  ;;  %v444_v49 = vpop.f32.mrb[12].mxu1 }
 0x10e   :  { %v598_v50 = vadd.f32 %v983_v44, %v371_v48  ;;  %v600_v51 = vadd.f32 %v985_v45, %v444_v49  ;;  %v373_v52 = vpop.f32.mrb[13].mxu0  ;;  %v446_v53 = vpop.f32.mrb[13].mxu1 }
 0x10f   :  { %v599_v54 = vadd.f32 %v987_v46, %v373_v52  ;;  %v601_v55 = vadd.f32 %v989_v47, %v446_v53  ;;  %v375_v56 = vpop.f32.mrb[14].mxu0  ;;  %v448_v57 = vpop.f32.mrb[14].mxu1 }
 0x110   :  { %v602_v58 = vadd.f32 %v983_v44, %v375_v56  ;;  %v604_v59 = vadd.f32 %v985_v45, %v448_v57  ;;  %v377_v60 = vpop.f32.mrb[15].mxu0  ;;  %v450_v61 = vpop.f32.mrb[15].mxu1 }
 0x111   :  { %v786_v62 = vpack.c.bf16 %v599_v54, %v598_v50  ;;  %v787_v63 = vpack.c.bf16 %v601_v55, %v600_v51  ;;  %v603_v0 = vadd.f32 %v987_v46, %v377_v60  ;;  %v605_v1 = vadd.f32 %v989_v47, %v450_v61 }
 0x113   :  { %714 = vst [vmem:[%s1074_s3 + $0x60] sm:$0xff] %v786_v62  ;;  %715 = vst [vmem:[%s1074_s3 + $0x68] sm:$0xff] %v787_v63  ;;  %v788_v2 = vpack.c.bf16 %v603_v0, %v602_v58  ;;  %v789_v44 = vpack.c.bf16 %v605_v1, %v604_v59 }
 0x115   :  { %716 = vst [vmem:[%s1074_s3 + $0x70] sm:$0xff] %v788_v2  ;;  %717 = vst [vmem:[%s1074_s3 + $0x78] sm:$0xff] %v789_v44 }

// kernel: lstm_model_forward.6
= control target key start
LH: loop header
LB: loop body
LE: loop exit
PB: predicated region body
PF: predicated region fallthrough
CT: control target
= control target key end

     0   :  { %s2021_s0 = inlined_call_operand.vmem [shape: bf16[8,8,512], index: 0, kind: input, shape index: {}]   ;;  %s2022_s1 = inlined_call_operand.vmem [shape: bf16[128,512], index: 1, kind: input, shape index: {}]   ;;  %s2023_s2 = inlined_call_operand.vmem [shape: bf16[8,8,128], index: 2, kind: output, shape index: {}]  }
   0x1   :  { %v31_v0 = vld [vmem:[%s2022_s1] sm:$0xf]  ;;  %v33_v1 = vld [vmem:[%s2022_s1 + $0x10] sm:$0xf]  ;;  %v35_v2 = vld [vmem:[%s2022_s1 + $0x4] sm:$0xf] }
   0x2   :  { %32 = vst [vmem:[#allocation2] sm:$0xf] %v31_v0  ;;  %34 = vst [vmem:[#allocation2 + $0x4] sm:$0xf] %v33_v1  ;;  %v37_v3 = vld [vmem:[%s2022_s1 + $0x14] sm:$0xf] }
   0x3   :  { %36 = vst [vmem:[#allocation2 + $0x8] sm:$0xf] %v35_v2  ;;  %v39_v4 = vld [vmem:[%s2022_s1 + $0x8] sm:$0xf]  ;;  %v41_v5 = vld [vmem:[%s2022_s1 + $0x18] sm:$0xf] }
   0x4   :  { %38 = vst [vmem:[#allocation2 + $0xc] sm:$0xf] %v37_v3  ;;  %40 = vst [vmem:[#allocation2 + $0x10] sm:$0xf] %v39_v4  ;;  %v43_v6 = vld [vmem:[%s2022_s1 + $0xc] sm:$0xf] }
   0x5   :  { %42 = vst [vmem:[#allocation2 + $0x14] sm:$0xf] %v41_v5  ;;  %v45_v7 = vld [vmem:[%s2022_s1 + $0x1c] sm:$0xff]   ;;  %v49_v8 = vld [vmem:[%s2022_s1 + $0x30] sm:$0xf] }
   0x6   :  { %44 = vst [vmem:[#allocation2 + $0x18] sm:$0xf] %v43_v6  ;;  %46 = vst [vmem:[#allocation2 + $0x1c] sm:$0xff] %v45_v7   ;;  %v51_v9 = vld [vmem:[%s2022_s1 + $0x24] sm:$0xf]  ;;  %v61_v14 = vld [vmem:[%s2022_s1 + $0x3c] sm:$0xff]  }
   0x7   :  { %50 = vst [vmem:[#allocation2 + $0x24] sm:$0xf] %v49_v8  ;;  %v53_v10 = vld [vmem:[%s2022_s1 + $0x34] sm:$0xf]  ;;  %v55_v11 = vld [vmem:[%s2022_s1 + $0x28] sm:$0xf] }
   0x8   :  { %52 = vst [vmem:[#allocation2 + $0x28] sm:$0xf] %v51_v9  ;;  %54 = vst [vmem:[#allocation2 + $0x2c] sm:$0xf] %v53_v10  ;;  %v57_v12 = vld [vmem:[%s2022_s1 + $0x38] sm:$0xf] }
   0x9   :  { %56 = vst [vmem:[#allocation2 + $0x30] sm:$0xf] %v55_v11  ;;  %v59_v13 = vld [vmem:[%s2022_s1 + $0x2c] sm:$0xf]  ;;  %58 = vst [vmem:[#allocation2 + $0x34] sm:$0xf] %v57_v12 }
   0xa   :  { %60 = vst [vmem:[#allocation2 + $0x38] sm:$0xf] %v59_v13  ;;  %62 = vst [vmem:[#allocation2 + $0x3c] sm:$0xff] %v61_v14   ;;  %v65_v15 = vld [vmem:[%s2022_s1 + $0x50] sm:$0xf]  ;;  %v77_v21 = vld [vmem:[%s2022_s1 + $0x5c] sm:$0xff]  }
   0xb   :  { %v67_v16 = vld [vmem:[%s2022_s1 + $0x44] sm:$0xf]  ;;  %v69_v17 = vld [vmem:[%s2022_s1 + $0x54] sm:$0xf]  ;;  %66 = vst [vmem:[#allocation2 + $0x44] sm:$0xf] %v65_v15 }
   0xc   :  { %68 = vst [vmem:[#allocation2 + $0x48] sm:$0xf] %v67_v16  ;;  %70 = vst [vmem:[#allocation2 + $0x4c] sm:$0xf] %v69_v17  ;;  %v71_v18 = vld [vmem:[%s2022_s1 + $0x48] sm:$0xf] }
   0xd   :  { %v73_v19 = vld [vmem:[%s2022_s1 + $0x58] sm:$0xf]  ;;  %v75_v20 = vld [vmem:[%s2022_s1 + $0x4c] sm:$0xf]  ;;  %72 = vst [vmem:[#allocation2 + $0x50] sm:$0xf] %v71_v18 }
   0xe   :  { %74 = vst [vmem:[#allocation2 + $0x54] sm:$0xf] %v73_v19  ;;  %76 = vst [vmem:[#allocation2 + $0x58] sm:$0xf] %v75_v20  ;;  %v81_v22 = vld [vmem:[%s2022_s1 + $0x70] sm:$0xf] }
   0xf   :  { %v83_v23 = vld [vmem:[%s2022_s1 + $0x64] sm:$0xf]  ;;  %78 = vst [vmem:[#allocation2 + $0x5c] sm:$0xff] %v77_v21   ;;  %82 = vst [vmem:[#allocation2 + $0x64] sm:$0xf] %v81_v22  ;;  %v93_v28 = vld [vmem:[%s2022_s1 + $0x7c] sm:$0xff]  }
  0x10   :  { %84 = vst [vmem:[#allocation2 + $0x68] sm:$0xf] %v83_v23  ;;  %v85_v24 = vld [vmem:[%s2022_s1 + $0x74] sm:$0xf]  ;;  %v87_v25 = vld [vmem:[%s2022_s1 + $0x68] sm:$0xf] }
  0x11   :  { %v89_v26 = vld [vmem:[%s2022_s1 + $0x78] sm:$0xf]  ;;  %86 = vst [vmem:[#allocation2 + $0x6c] sm:$0xf] %v85_v24  ;;  %88 = vst [vmem:[#allocation2 + $0x70] sm:$0xf] %v87_v25 }
  0x12   :  { %90 = vst [vmem:[#allocation2 + $0x74] sm:$0xf] %v89_v26  ;;  %v91_v27 = vld [vmem:[%s2022_s1 + $0x6c] sm:$0xf]  ;;  %v97_v29 = vld [vmem:[%s2022_s1 + $0x90] sm:$0xf] }
  0x13   :  { %92 = vst [vmem:[#allocation2 + $0x78] sm:$0xf] %v91_v27  ;;  %94 = vst [vmem:[#allocation2 + $0x7c] sm:$0xff] %v93_v28   ;;  %v99_v30 = vld [vmem:[%s2022_s1 + $0x84] sm:$0xf]  ;;  %v109_v35 = vld [vmem:[%s2022_s1 + $0x9c] sm:$0xff]  }
  0x14   :  { %98 = vst [vmem:[#allocation2 + $0x84] sm:$0xf] %v97_v29  ;;  %v101_v31 = vld [vmem:[%s2022_s1 + $0x94] sm:$0xf]  ;;  %v103_v32 = vld [vmem:[%s2022_s1 + $0x88] sm:$0xf] }
  0x15   :  { %100 = vst [vmem:[#allocation2 + $0x88] sm:$0xf] %v99_v30  ;;  %102 = vst [vmem:[#allocation2 + $0x8c] sm:$0xf] %v101_v31  ;;  %v105_v33 = vld [vmem:[%s2022_s1 + $0x98] sm:$0xf] }
  0x16   :  { %104 = vst [vmem:[#allocation2 + $0x90] sm:$0xf] %v103_v32  ;;  %v107_v34 = vld [vmem:[%s2022_s1 + $0x8c] sm:$0xf]  ;;  %106 = vst [vmem:[#allocation2 + $0x94] sm:$0xf] %v105_v33 }
  0x17   :  { %108 = vst [vmem:[#allocation2 + $0x98] sm:$0xf] %v107_v34  ;;  %110 = vst [vmem:[#allocation2 + $0x9c] sm:$0xff] %v109_v35   ;;  %v113_v36 = vld [vmem:[%s2022_s1 + $0xb0] sm:$0xf]  ;;  %v125_v42 = vld [vmem:[%s2022_s1 + $0xbc] sm:$0xff]  }
  0x18   :  { %v115_v37 = vld [vmem:[%s2022_s1 + $0xa4] sm:$0xf]  ;;  %v117_v38 = vld [vmem:[%s2022_s1 + $0xb4] sm:$0xf]  ;;  %114 = vst [vmem:[#allocation2 + $0xa4] sm:$0xf] %v113_v36 }
  0x19   :  { %116 = vst [vmem:[#allocation2 + $0xa8] sm:$0xf] %v115_v37  ;;  %118 = vst [vmem:[#allocation2 + $0xac] sm:$0xf] %v117_v38  ;;  %v119_v39 = vld [vmem:[%s2022_s1 + $0xa8] sm:$0xf] }
  0x1a   :  { %v121_v40 = vld [vmem:[%s2022_s1 + $0xb8] sm:$0xf]  ;;  %v123_v41 = vld [vmem:[%s2022_s1 + $0xac] sm:$0xf]  ;;  %120 = vst [vmem:[#allocation2 + $0xb0] sm:$0xf] %v119_v39 }
  0x1b   :  { %122 = vst [vmem:[#allocation2 + $0xb4] sm:$0xf] %v121_v40  ;;  %124 = vst [vmem:[#allocation2 + $0xb8] sm:$0xf] %v123_v41  ;;  %v129_v43 = vld [vmem:[%s2022_s1 + $0xd0] sm:$0xf] }
  0x1c   :  { %v131_v44 = vld [vmem:[%s2022_s1 + $0xc4] sm:$0xf]  ;;  %126 = vst [vmem:[#allocation2 + $0xbc] sm:$0xff] %v125_v42   ;;  %130 = vst [vmem:[#allocation2 + $0xc4] sm:$0xf] %v129_v43  ;;  %v141_v49 = vld [vmem:[%s2022_s1 + $0xdc] sm:$0xff]  }
  0x1d   :  { %132 = vst [vmem:[#allocation2 + $0xc8] sm:$0xf] %v131_v44  ;;  %v133_v45 = vld [vmem:[%s2022_s1 + $0xd4] sm:$0xf]  ;;  %v135_v46 = vld [vmem:[%s2022_s1 + $0xc8] sm:$0xf] }
  0x1e   :  { %v137_v47 = vld [vmem:[%s2022_s1 + $0xd8] sm:$0xf]  ;;  %134 = vst [vmem:[#allocation2 + $0xcc] sm:$0xf] %v133_v45  ;;  %136 = vst [vmem:[#allocation2 + $0xd0] sm:$0xf] %v135_v46 }
  0x1f   :  { %138 = vst [vmem:[#allocation2 + $0xd4] sm:$0xf] %v137_v47  ;;  %v139_v48 = vld [vmem:[%s2022_s1 + $0xcc] sm:$0xf]  ;;  %v145_v50 = vld [vmem:[%s2022_s1 + $0xf0] sm:$0xf] }
  0x20   :  { %140 = vst [vmem:[#allocation2 + $0xd8] sm:$0xf] %v139_v48  ;;  %142 = vst [vmem:[#allocation2 + $0xdc] sm:$0xff] %v141_v49   ;;  %v147_v51 = vld [vmem:[%s2022_s1 + $0xe4] sm:$0xf] }
  0x21   :  { %146 = vst [vmem:[#allocation2 + $0xe4] sm:$0xf] %v145_v50  ;;  %v149_v52 = vld [vmem:[%s2022_s1 + $0xf4] sm:$0xf]  ;;  %v151_v53 = vld [vmem:[%s2022_s1 + $0xe8] sm:$0xf] }
  0x22   :  { %148 = vst [vmem:[#allocation2 + $0xe8] sm:$0xf] %v147_v51  ;;  %150 = vst [vmem:[#allocation2 + $0xec] sm:$0xf] %v149_v52  ;;  %v153_v54 = vld [vmem:[%s2022_s1 + $0xf8] sm:$0xf] }
  0x23   :  { %152 = vst [vmem:[#allocation2 + $0xf0] sm:$0xf] %v151_v53  ;;  %v155_v55 = vld [vmem:[%s2022_s1 + $0xec] sm:$0xf]  ;;  %v157_v56 = vld [vmem:[%s2022_s1 + $0xfc] sm:$0xf] }
  0x24   :  { %154 = vst [vmem:[#allocation2 + $0xf4] sm:$0xf] %v153_v54  ;;  %156 = vst [vmem:[#allocation2 + $0xf8] sm:$0xf] %v155_v55 }
  0x25   :  { %158 = vst [vmem:[#allocation2 + $0xfc] sm:$0xf] %v157_v56 }
  0x26   :  { %317 = vsyncadd [#allocation3], 4096 }
  0x27   :  { %1429 = dma.done.wait [#allocation3], 4096 }
  0x28   :  { %1430 = vsyncadd [#allocation3], 4294963200  ;;  %v1431_v57 = vmov 0   ;;  %v1621_v58 = vld [vmem:[#allocation2 + $0x8] sm:$0xff]  ;;  %v1623_v59 = vld [vmem:[#allocation2] sm:$0xff]  ;;  %v1432_v26 = vmov 0.0|0.0  }
  0x29   :  { %397 = vmatprep.mubr.bf16.mxu0 %v1431_v57  ;;  %438 = vmatprep.mubr.bf16.mxu1 %v1431_v57  ;;  %v1625_v60 = vld [vmem:[#allocation2 + $0x28] sm:$0xff]  ;;  %v1628_v61 = vld [vmem:[#allocation2 + $0x18] sm:$0xff]  ;;  %v1630_v62 = vld [vmem:[#allocation2 + $0x10] sm:$0xff] }
  0x2a   :  { %365 = vmatprep.subr.bf16.mxu0 %v1621_v58  ;;  %406 = vmatprep.subr.bf16.mxu1 %v1628_v61  ;;  %v1634_v63 = vld [vmem:[#allocation2 + $0x38] sm:$0xff]  ;;  %v1637_v0 = vld [vmem:[#allocation2 + $0x20] sm:$0xff]  ;;  %v1640_v1 = vld [vmem:[#allocation2 + $0x48] sm:$0xff] }
  0x2b   :  { %366 = vmatpush1.bf16.msra.mxu0 %v1623_v59  ;;  %407 = vmatpush1.bf16.msra.mxu1 %v1630_v62  ;;  %v1643_v2 = vld [vmem:[#allocation2 + $0x30] sm:$0xff]  ;;  %v1645_v3 = vld [vmem:[#allocation2 + $0x58] sm:$0xff]  ;;  %v1649_v4 = vld [vmem:[#allocation2 + $0x40] sm:$0xff] }
  0x2c   :  { %367 = vmatprep.subr.bf16.mxu0 %v1625_v60  ;;  %408 = vmatprep.subr.bf16.mxu1 %v1634_v63  ;;  %v1652_v5 = vld [vmem:[#allocation2 + $0x68] sm:$0xff]  ;;  %v1655_v6 = vld [vmem:[#allocation2 + $0x50] sm:$0xff]  ;;  %v1657_v7 = vld [vmem:[#allocation2 + $0x78] sm:$0xff] }
  0x2d   :  { %v1661_v8 = vld [vmem:[#allocation2 + $0x60] sm:$0xff]  ;;  %v1664_v9 = vld [vmem:[#allocation2 + $0x88] sm:$0xff]  ;;  %v1667_v10 = vld [vmem:[#allocation2 + $0x70] sm:$0xff] }
  0x2e   :  { %v1669_v11 = vld [vmem:[#allocation2 + $0x98] sm:$0xff]  ;;  %v1673_v12 = vld [vmem:[#allocation2 + $0x80] sm:$0xff]  ;;  %v1676_v13 = vld [vmem:[#allocation2 + $0xa8] sm:$0xff] }
  0x2f   :  { %368 = vmatpush1.bf16.msra.mxu0 %v1637_v0  ;;  %409 = vmatpush1.bf16.msra.mxu1 %v1643_v2  ;;  %v1679_v14 = vld [vmem:[#allocation2 + $0x90] sm:$0xff]  ;;  %v1681_v15 = vld [vmem:[#allocation2 + $0xb8] sm:$0xff]  ;;  %v1685_v16 = vld [vmem:[#allocation2 + $0xa0] sm:$0xff] }
  0x30   :  { %369 = vmatprep.subr.bf16.mxu0 %v1640_v1  ;;  %410 = vmatprep.subr.bf16.mxu1 %v1645_v3  ;;  %v1688_v17 = vld [vmem:[#allocation2 + $0xc8] sm:$0xff]  ;;  %v1691_v18 = vld [vmem:[#allocation2 + $0xb0] sm:$0xff]  ;;  %v1693_v19 = vld [vmem:[#allocation2 + $0xd8] sm:$0xff] }
  0x31   :  { %v1697_v20 = vld [vmem:[#allocation2 + $0xc0] sm:$0xff]  ;;  %v1700_v21 = vld [vmem:[#allocation2 + $0xe8] sm:$0xff]  ;;  %v1703_v22 = vld [vmem:[#allocation2 + $0xd0] sm:$0xff] }
  0x32   :  { %v1705_v23 = vld [vmem:[#allocation2 + $0xf8] sm:$0xff]  ;;  %v1709_v24 = vld [vmem:[#allocation2 + $0xe0] sm:$0xff]  ;;  %v1713_v25 = vld [vmem:[#allocation2 + $0xf0] sm:$0xff] }
  0x33   :  { %370 = vmatpush1.bf16.msra.mxu0 %v1649_v4  ;;  %411 = vmatpush1.bf16.msra.mxu1 %v1655_v6  ;;  %v358_v27 = vld [vmem:[%s2021_s0] sm:$0xff]  ;;  %v359_v28 = vld [vmem:[%s2021_s0 + $0x8] sm:$0xff] }
  0x34   :  { %371 = vmatprep.subr.bf16.mxu0 %v1652_v5  ;;  %412 = vmatprep.subr.bf16.mxu1 %v1657_v7  ;;  %v360_v29 = vunpack.c.l.bf16 %v358_v27  ;;  %v361_v30 = vunpack.c.h.bf16 %v358_v27  ;;  %v362_v31 = vunpack.c.l.bf16 %v359_v28  ;;  %v363_v45 = vunpack.c.h.bf16 %v359_v28 }
  0x37   :  { %372 = vmatpush1.bf16.msra.mxu0 %v1661_v8  ;;  %413 = vmatpush1.bf16.msra.mxu1 %v1667_v10 }
  0x38   :  { %373 = vmatprep.subr.bf16.mxu0 %v1664_v9  ;;  %414 = vmatprep.subr.bf16.mxu1 %v1669_v11 }
  0x3b   :  { %374 = vmatpush1.bf16.msra.mxu0 %v1673_v12  ;;  %415 = vmatpush1.bf16.msra.mxu1 %v1679_v14 }
  0x3c   :  { %375 = vmatprep.subr.bf16.mxu0 %v1676_v13  ;;  %416 = vmatprep.subr.bf16.mxu1 %v1681_v15 }
  0x3f   :  { %376 = vmatpush1.bf16.msra.mxu0 %v1685_v16  ;;  %417 = vmatpush1.bf16.msra.mxu1 %v1691_v18 }
  0x40   :  { %377 = vmatprep.subr.bf16.mxu0 %v1688_v17  ;;  %418 = vmatprep.subr.bf16.mxu1 %v1693_v19 }
  0x43   :  { %378 = vmatpush1.bf16.msra.mxu0 %v1697_v20  ;;  %419 = vmatpush1.bf16.msra.mxu1 %v1703_v22 }
  0x44   :  { %379 = vmatprep.subr.bf16.mxu0 %v1700_v21  ;;  %420 = vmatprep.subr.bf16.mxu1 %v1705_v23 }
  0x47   :  { %380 = vmatpush1.bf16.msra.mxu0 %v1709_v24  ;;  %421 = vmatpush1.bf16.msra.mxu1 %v1713_v25 }
  0x48   :  { %478 = vmatprep.subr.bf16.mxu0 %v1621_v58  ;;  %519 = vmatprep.subr.bf16.mxu1 %v1628_v61 }
  0x4a   :  { %398 = vmatmul.mubr.bf16.vlgmr.msra.gmra.mrb[0].mxu0 %v1432_v26  ;;  %439 = vmatmul.mubr.bf16.vlgmr.msra.gmra.mrb[0].mxu1 %v1432_v26 }
  0x4b   :  { %479 = vmatpush1.bf16.msra.mxu0 %v1623_v59  ;;  %520 = vmatpush1.bf16.msra.mxu1 %v1630_v62 }
  0x4c   :  { %480 = vmatprep.subr.bf16.mxu0 %v1625_v60  ;;  %521 = vmatprep.subr.bf16.mxu1 %v1634_v63 }
  0x4d   :  { %510 = vmatprep.mubr.bf16.mxu0 %v1431_v57  ;;  %551 = vmatprep.mubr.bf16.mxu1 %v1431_v57 }
  0x4f   :  { %481 = vmatpush1.bf16.msra.mxu0 %v1637_v0  ;;  %522 = vmatpush1.bf16.msra.mxu1 %v1643_v2 }
  0x50   :  { %482 = vmatprep.subr.bf16.mxu0 %v1640_v1  ;;  %523 = vmatprep.subr.bf16.mxu1 %v1645_v3 }
  0x53   :  { %483 = vmatpush1.bf16.msra.mxu0 %v1649_v4  ;;  %524 = vmatpush1.bf16.msra.mxu1 %v1655_v6 }
  0x54   :  { %484 = vmatprep.subr.bf16.mxu0 %v1652_v5  ;;  %525 = vmatprep.subr.bf16.mxu1 %v1657_v7 }
  0x57   :  { %485 = vmatpush1.bf16.msra.mxu0 %v1661_v8  ;;  %526 = vmatpush1.bf16.msra.mxu1 %v1667_v10 }
  0x58   :  { %486 = vmatprep.subr.bf16.mxu0 %v1664_v9  ;;  %527 = vmatprep.subr.bf16.mxu1 %v1669_v11 }
  0x5b   :  { %487 = vmatpush1.bf16.msra.mxu0 %v1673_v12  ;;  %528 = vmatpush1.bf16.msra.mxu1 %v1679_v14 }
  0x5c   :  { %488 = vmatprep.subr.bf16.mxu0 %v1676_v13  ;;  %529 = vmatprep.subr.bf16.mxu1 %v1681_v15 }
  0x5f   :  { %489 = vmatpush1.bf16.msra.mxu0 %v1685_v16  ;;  %530 = vmatpush1.bf16.msra.mxu1 %v1691_v18 }
  0x60   :  { %490 = vmatprep.subr.bf16.mxu0 %v1688_v17  ;;  %531 = vmatprep.subr.bf16.mxu1 %v1693_v19 }
  0x63   :  { %491 = vmatpush1.bf16.msra.mxu0 %v1697_v20  ;;  %532 = vmatpush1.bf16.msra.mxu1 %v1703_v22 }
  0x64   :  { %492 = vmatprep.subr.bf16.mxu0 %v1700_v21  ;;  %533 = vmatprep.subr.bf16.mxu1 %v1705_v23 }
  0x67   :  { %493 = vmatpush1.bf16.msra.mxu0 %v1709_v24  ;;  %534 = vmatpush1.bf16.msra.mxu1 %v1713_v25 }
  0x68   :  { %592 = vmatprep.subr.bf16.mxu0 %v1621_v58  ;;  %633 = vmatprep.subr.bf16.mxu1 %v1628_v61 }
 0x11d   :  { %v399_v32 = vpop.f32.mrb[0].mxu0  ;;  %v440_v35 = vpop.f32.mrb[0].mxu1 }
 0x11e   :  { %v447_v33 = vadd.f32 %v399_v32, %v360_v29  ;;  %v401_v34 = vpop.f32.mrb[1].mxu0  ;;  %v442_v38 = vpop.f32.mrb[1].mxu1  ;;  %v449_v41 = vadd.f32 %v440_v35, %v362_v31  ;;  %v1296_v35 = vld [vmem:[%s2021_s0 + $0x18] sm:$0xff] }
 0x11f   :  { %v448_v36 = vadd.f32 %v401_v34, %v361_v30  ;;  %v403_v37 = vpop.f32.mrb[2].mxu0  ;;  %v444_v42 = vpop.f32.mrb[2].mxu1  ;;  %v450_v46 = vadd.f32 %v442_v38, %v363_v45 }
 0x120   :  { %v451_v39 = vmul.f32 0.5, %v447_v33  ;;  %v404_v40 = vpop.f32.mrb[3].mxu0  ;;  %v445_v44 = vpop.f32.mrb[3].mxu1  ;;  %v1295_v33 = vld [vmem:[%s2021_s0 + $0x10] sm:$0xff] }
 0x121   :  { %v455_v43 = vmul.f32 0.5, %v448_v36  ;;  %v460_v47 = vmul.f32 0.5, %v450_v46  ;;  %v474_v34 = vunpack.c.l.bf16 %v1295_v33  ;;  %v475_v36 = vunpack.c.h.bf16 %v1295_v33 }
 0x122   :  { %1319 = vtanh.f32 %v451_v39  ;;  %v476_v40 = vunpack.c.l.bf16 %v1296_v35 }
 0x123   :  { %1321 = vtanh.f32 %v455_v43 }
 0x124   :  { %1323 = vtanh.f32 %v449_v41 }
 0x125   :  { %1325 = vtanh.f32 %v460_v47 }
 0x12c   :  { %v1320_v48 = vpop.eup %1319 }
 0x12d   :  { %v1322_v49 = vpop.eup %1321  ;;  %v453_v50 = vadd.f32 1.0, %v1320_v48 }
 0x12e   :  { %v1324_v51 = vpop.eup %1323  ;;  %v457_v52 = vadd.f32 1.0, %v1322_v49 }
 0x12f   :  { %v454_v53 = vmul.f32 0.5, %v453_v50  ;;  %v1326_v27 = vpop.eup %1325 }
 0x130   :  { %v458_v54 = vmul.f32 0.5, %v457_v52  ;;  %v462_v28 = vadd.f32 1.0, %v1326_v27 }
 0x131   :  { %v465_v55 = vmul.f32 %v1324_v51, %v454_v53  ;;  %v477_v51 = vunpack.c.h.bf16 %v1296_v35 }
 0x132   :  { %v464_v56 = vmul.f32 0.0, %v458_v54  ;;  %v463_v29 = vmul.f32 0.5, %v462_v28 }
 0x134   :  { %v1759_v26 = vadd.f32 %v465_v55, %v464_v56 }
 0x136   :  { %1327 = vtanh.f32 %v1759_v26 }
 0x140   :  { %v1328_v30 = vpop.eup %1327 }
 0x141   :  { %v468_v31 = vmul.f32 %v1328_v30, %v463_v29 }
 0x143   :  { %v469_v32 = vpack.c.bf16 %v468_v31, %v468_v31 }
 0x145   :  { %470 = vst [vmem:[%s2023_s2] sm:$0xf] %v469_v32  ;;  %511 = vmatmul.mubr.bf16.vlgmr.msra.gmra.mrb[4].mxu0 %v469_v32  ;;  %552 = vmatmul.mubr.bf16.vlgmr.msra.gmra.mrb[4].mxu1 %v469_v32 }
 0x146   :  { %593 = vmatpush1.bf16.msra.mxu0 %v1623_v59  ;;  %634 = vmatpush1.bf16.msra.mxu1 %v1630_v62 }
 0x147   :  { %594 = vmatprep.subr.bf16.mxu0 %v1625_v60  ;;  %635 = vmatprep.subr.bf16.mxu1 %v1634_v63 }
 0x148   :  { %624 = vmatprep.mubr.bf16.mxu0 %v1431_v57  ;;  %665 = vmatprep.mubr.bf16.mxu1 %v1431_v57 }
 0x14a   :  { %595 = vmatpush1.bf16.msra.mxu0 %v1637_v0  ;;  %636 = vmatpush1.bf16.msra.mxu1 %v1643_v2 }
 0x14b   :  { %596 = vmatprep.subr.bf16.mxu0 %v1640_v1  ;;  %637 = vmatprep.subr.bf16.mxu1 %v1645_v3 }
 0x14e   :  { %597 = vmatpush1.bf16.msra.mxu0 %v1649_v4  ;;  %638 = vmatpush1.bf16.msra.mxu1 %v1655_v6 }
 0x14f   :  { %598 = vmatprep.subr.bf16.mxu0 %v1652_v5  ;;  %639 = vmatprep.subr.bf16.mxu1 %v1657_v7 }
 0x152   :  { %599 = vmatpush1.bf16.msra.mxu0 %v1661_v8  ;;  %640 = vmatpush1.bf16.msra.mxu1 %v1667_v10 }
 0x153   :  { %600 = vmatprep.subr.bf16.mxu0 %v1664_v9  ;;  %641 = vmatprep.subr.bf16.mxu1 %v1669_v11 }
 0x156   :  { %601 = vmatpush1.bf16.msra.mxu0 %v1673_v12  ;;  %642 = vmatpush1.bf16.msra.mxu1 %v1679_v14 }
 0x157   :  { %602 = vmatprep.subr.bf16.mxu0 %v1676_v13  ;;  %643 = vmatprep.subr.bf16.mxu1 %v1681_v15 }
 0x15a   :  { %603 = vmatpush1.bf16.msra.mxu0 %v1685_v16  ;;  %644 = vmatpush1.bf16.msra.mxu1 %v1691_v18 }
 0x15b   :  { %604 = vmatprep.subr.bf16.mxu0 %v1688_v17  ;;  %645 = vmatprep.subr.bf16.mxu1 %v1693_v19 }
 0x15e   :  { %605 = vmatpush1.bf16.msra.mxu0 %v1697_v20  ;;  %646 = vmatpush1.bf16.msra.mxu1 %v1703_v22 }
 0x15f   :  { %606 = vmatprep.subr.bf16.mxu0 %v1700_v21  ;;  %647 = vmatprep.subr.bf16.mxu1 %v1705_v23 }
 0x162   :  { %607 = vmatpush1.bf16.msra.mxu0 %v1709_v24  ;;  %648 = vmatpush1.bf16.msra.mxu1 %v1713_v25 }
 0x163   :  { %706 = vmatprep.subr.bf16.mxu0 %v1621_v58  ;;  %747 = vmatprep.subr.bf16.mxu1 %v1628_v61 }
 0x218   :  { %v512_v37 = vpop.f32.mrb[4].mxu0  ;;  %v553_v38 = vpop.f32.mrb[4].mxu1 }
 0x219   :  { %v560_v39 = vadd.f32 %v512_v37, %v474_v34  ;;  %v514_v41 = vpop.f32.mrb[5].mxu0  ;;  %v555_v42 = vpop.f32.mrb[5].mxu1  ;;  %v562_v50 = vadd.f32 %v553_v38, %v476_v40 }
 0x21a   :  { %v561_v43 = vadd.f32 %v514_v41, %v475_v36  ;;  %v516_v44 = vpop.f32.mrb[6].mxu0  ;;  %v557_v45 = vpop.f32.mrb[6].mxu1  ;;  %v563_v52 = vadd.f32 %v555_v42, %v477_v51  ;;  %v1299_v41 = vld [vmem:[%s2021_s0 + $0x28] sm:$0xff] }
 0x21b   :  { %v564_v46 = vmul.f32 0.5, %v560_v39  ;;  %v517_v47 = vpop.f32.mrb[7].mxu0  ;;  %v558_v48 = vpop.f32.mrb[7].mxu1 }
 0x21c   :  { %v568_v49 = vmul.f32 0.5, %v561_v43  ;;  %v573_v53 = vmul.f32 0.5, %v563_v52 }
 0x21d   :  { %1329 = vtanh.f32 %v564_v46  ;;  %v590_v46 = vunpack.c.l.bf16 %v1299_v41 }
 0x21e   :  { %1331 = vtanh.f32 %v568_v49 }
 0x21f   :  { %1333 = vtanh.f32 %v562_v50 }
 0x220   :  { %1335 = vtanh.f32 %v573_v53 }
 0x227   :  { %v1330_v54 = vpop.eup %1329 }
 0x228   :  { %v1332_v55 = vpop.eup %1331  ;;  %v566_v56 = vadd.f32 1.0, %v1330_v54 }
 0x229   :  { %v570_v27 = vadd.f32 1.0, %v1332_v55  ;;  %v1334_v29 = vpop.eup %1333 }
 0x22a   :  { %v567_v28 = vmul.f32 0.5, %v566_v56  ;;  %v1336_v34 = vpop.eup %1335 }
 0x22b   :  { %v571_v30 = vmul.f32 0.5, %v570_v27  ;;  %v575_v35 = vadd.f32 1.0, %v1336_v34  ;;  %v591_v27 = vunpack.c.h.bf16 %v1299_v41 }
 0x22c   :  { %v578_v31 = vmul.f32 %v1334_v29, %v567_v28 }
 0x22d   :  { %v577_v32 = vmul.f32 %v571_v30, %v1759_v26  ;;  %v576_v36 = vmul.f32 0.5, %v575_v35  ;;  %v1298_v26 = vld [vmem:[%s2021_s0 + $0x20] sm:$0xff] }
 0x22e   :  { %v588_v40 = vunpack.c.l.bf16 %v1298_v26  ;;  %v589_v42 = vunpack.c.h.bf16 %v1298_v26 }
 0x22f   :  { %v1806_v33 = vadd.f32 %v578_v31, %v577_v32 }
 0x231   :  { %1337 = vtanh.f32 %v1806_v33 }
 0x23b   :  { %v1338_v37 = vpop.eup %1337 }
 0x23c   :  { %v581_v38 = vmul.f32 %v1338_v37, %v576_v36 }
 0x23e   :  { %v582_v39 = vpack.c.bf16 %v581_v38, %v581_v38 }
 0x240   :  { %1297 = vst [vmem:[%s2023_s2 + $0x4] sm:$0xf] %v582_v39  ;;  %625 = vmatmul.mubr.bf16.vlgmr.msra.gmra.mrb[8].mxu0 %v582_v39  ;;  %666 = vmatmul.mubr.bf16.vlgmr.msra.gmra.mrb[8].mxu1 %v582_v39 }
 0x241   :  { %707 = vmatpush1.bf16.msra.mxu0 %v1623_v59  ;;  %748 = vmatpush1.bf16.msra.mxu1 %v1630_v62 }
 0x242   :  { %708 = vmatprep.subr.bf16.mxu0 %v1625_v60  ;;  %749 = vmatprep.subr.bf16.mxu1 %v1634_v63 }
 0x243   :  { %738 = vmatprep.mubr.bf16.mxu0 %v1431_v57  ;;  %779 = vmatprep.mubr.bf16.mxu1 %v1431_v57 }
 0x245   :  { %709 = vmatpush1.bf16.msra.mxu0 %v1637_v0  ;;  %750 = vmatpush1.bf16.msra.mxu1 %v1643_v2 }
 0x246   :  { %710 = vmatprep.subr.bf16.mxu0 %v1640_v1  ;;  %751 = vmatprep.subr.bf16.mxu1 %v1645_v3 }
 0x249   :  { %711 = vmatpush1.bf16.msra.mxu0 %v1649_v4  ;;  %752 = vmatpush1.bf16.msra.mxu1 %v1655_v6 }
 0x24a   :  { %712 = vmatprep.subr.bf16.mxu0 %v1652_v5  ;;  %753 = vmatprep.subr.bf16.mxu1 %v1657_v7 }
 0x24d   :  { %713 = vmatpush1.bf16.msra.mxu0 %v1661_v8  ;;  %754 = vmatpush1.bf16.msra.mxu1 %v1667_v10 }
 0x24e   :  { %714 = vmatprep.subr.bf16.mxu0 %v1664_v9  ;;  %755 = vmatprep.subr.bf16.mxu1 %v1669_v11 }
 0x251   :  { %715 = vmatpush1.bf16.msra.mxu0 %v1673_v12  ;;  %756 = vmatpush1.bf16.msra.mxu1 %v1679_v14 }
 0x252   :  { %716 = vmatprep.subr.bf16.mxu0 %v1676_v13  ;;  %757 = vmatprep.subr.bf16.mxu1 %v1681_v15 }
 0x255   :  { %717 = vmatpush1.bf16.msra.mxu0 %v1685_v16  ;;  %758 = vmatpush1.bf16.msra.mxu1 %v1691_v18 }
 0x256   :  { %718 = vmatprep.subr.bf16.mxu0 %v1688_v17  ;;  %759 = vmatprep.subr.bf16.mxu1 %v1693_v19 }
 0x259   :  { %719 = vmatpush1.bf16.msra.mxu0 %v1697_v20  ;;  %760 = vmatpush1.bf16.msra.mxu1 %v1703_v22 }
 0x25a   :  { %720 = vmatprep.subr.bf16.mxu0 %v1700_v21  ;;  %761 = vmatprep.subr.bf16.mxu1 %v1705_v23 }
 0x25d   :  { %721 = vmatpush1.bf16.msra.mxu0 %v1709_v24  ;;  %762 = vmatpush1.bf16.msra.mxu1 %v1713_v25 }
 0x25e   :  { %820 = vmatprep.subr.bf16.mxu0 %v1621_v58  ;;  %861 = vmatprep.subr.bf16.mxu1 %v1628_v61 }
 0x313   :  { %v626_v43 = vpop.f32.mrb[8].mxu0  ;;  %v667_v44 = vpop.f32.mrb[8].mxu1 }
 0x314   :  { %v674_v45 = vadd.f32 %v626_v43, %v588_v40  ;;  %v628_v47 = vpop.f32.mrb[9].mxu0  ;;  %v669_v48 = vpop.f32.mrb[9].mxu1  ;;  %v676_v56 = vadd.f32 %v667_v44, %v590_v46 }
 0x315   :  { %v675_v49 = vadd.f32 %v628_v47, %v589_v42  ;;  %v630_v50 = vpop.f32.mrb[10].mxu0  ;;  %v671_v51 = vpop.f32.mrb[10].mxu1  ;;  %v677_v28 = vadd.f32 %v669_v48, %v591_v27  ;;  %v1302_v47 = vld [vmem:[%s2021_s0 + $0x38] sm:$0xff] }
 0x316   :  { %v678_v52 = vmul.f32 0.5, %v674_v45  ;;  %v631_v53 = vpop.f32.mrb[11].mxu0  ;;  %v672_v54 = vpop.f32.mrb[11].mxu1 }
 0x317   :  { %v682_v55 = vmul.f32 0.5, %v675_v49  ;;  %v687_v29 = vmul.f32 0.5, %v677_v28 }
 0x318   :  { %1339 = vtanh.f32 %v678_v52  ;;  %v704_v52 = vunpack.c.l.bf16 %v1302_v47 }
 0x319   :  { %1341 = vtanh.f32 %v682_v55 }
 0x31a   :  { %1343 = vtanh.f32 %v676_v56 }
 0x31b   :  { %1345 = vtanh.f32 %v687_v29 }
 0x322   :  { %v1340_v30 = vpop.eup %1339 }
 0x323   :  { %v1342_v31 = vpop.eup %1341  ;;  %v680_v32 = vadd.f32 1.0, %v1340_v30 }
 0x324   :  { %v684_v34 = vadd.f32 1.0, %v1342_v31  ;;  %v1344_v36 = vpop.eup %1343 }
 0x325   :  { %v681_v35 = vmul.f32 0.5, %v680_v32  ;;  %v1346_v40 = vpop.eup %1345 }
 0x326   :  { %v685_v37 = vmul.f32 0.5, %v684_v34  ;;  %v689_v41 = vadd.f32 1.0, %v1346_v40  ;;  %v705_v34 = vunpack.c.h.bf16 %v1302_v47 }
 0x327   :  { %v692_v38 = vmul.f32 %v1344_v36, %v681_v35 }
 0x328   :  { %v691_v39 = vmul.f32 %v685_v37, %v1806_v33  ;;  %v690_v42 = vmul.f32 0.5, %v689_v41  ;;  %v1301_v33 = vld [vmem:[%s2021_s0 + $0x30] sm:$0xff] }
 0x329   :  { %v702_v46 = vunpack.c.l.bf16 %v1301_v33  ;;  %v703_v48 = vunpack.c.h.bf16 %v1301_v33 }
 0x32a   :  { %v1853_v26 = vadd.f32 %v692_v38, %v691_v39 }
 0x32c   :  { %1347 = vtanh.f32 %v1853_v26 }
 0x336   :  { %v1348_v43 = vpop.eup %1347 }
 0x337   :  { %v695_v44 = vmul.f32 %v1348_v43, %v690_v42 }
 0x339   :  { %v696_v45 = vpack.c.bf16 %v695_v44, %v695_v44 }
 0x33b   :  { %1300 = vst [vmem:[%s2023_s2 + $0x8] sm:$0xf] %v696_v45  ;;  %739 = vmatmul.mubr.bf16.vlgmr.msra.gmra.mrb[12].mxu0 %v696_v45  ;;  %780 = vmatmul.mubr.bf16.vlgmr.msra.gmra.mrb[12].mxu1 %v696_v45 }
 0x33c   :  { %821 = vmatpush1.bf16.msra.mxu0 %v1623_v59  ;;  %862 = vmatpush1.bf16.msra.mxu1 %v1630_v62 }
 0x33d   :  { %822 = vmatprep.subr.bf16.mxu0 %v1625_v60  ;;  %863 = vmatprep.subr.bf16.mxu1 %v1634_v63 }
 0x33e   :  { %852 = vmatprep.mubr.bf16.mxu0 %v1431_v57  ;;  %893 = vmatprep.mubr.bf16.mxu1 %v1431_v57 }
 0x340   :  { %823 = vmatpush1.bf16.msra.mxu0 %v1637_v0  ;;  %864 = vmatpush1.bf16.msra.mxu1 %v1643_v2 }
 0x341   :  { %824 = vmatprep.subr.bf16.mxu0 %v1640_v1  ;;  %865 = vmatprep.subr.bf16.mxu1 %v1645_v3 }
 0x344   :  { %825 = vmatpush1.bf16.msra.mxu0 %v1649_v4  ;;  %866 = vmatpush1.bf16.msra.mxu1 %v1655_v6 }
 0x345   :  { %826 = vmatprep.subr.bf16.mxu0 %v1652_v5  ;;  %867 = vmatprep.subr.bf16.mxu1 %v1657_v7 }
 0x348   :  { %827 = vmatpush1.bf16.msra.mxu0 %v1661_v8  ;;  %868 = vmatpush1.bf16.msra.mxu1 %v1667_v10 }
 0x349   :  { %828 = vmatprep.subr.bf16.mxu0 %v1664_v9  ;;  %869 = vmatprep.subr.bf16.mxu1 %v1669_v11 }
 0x34c   :  { %829 = vmatpush1.bf16.msra.mxu0 %v1673_v12  ;;  %870 = vmatpush1.bf16.msra.mxu1 %v1679_v14 }
 0x34d   :  { %830 = vmatprep.subr.bf16.mxu0 %v1676_v13  ;;  %871 = vmatprep.subr.bf16.mxu1 %v1681_v15 }
 0x350   :  { %831 = vmatpush1.bf16.msra.mxu0 %v1685_v16  ;;  %872 = vmatpush1.bf16.msra.mxu1 %v1691_v18 }
 0x351   :  { %832 = vmatprep.subr.bf16.mxu0 %v1688_v17  ;;  %873 = vmatprep.subr.bf16.mxu1 %v1693_v19 }
 0x354   :  { %833 = vmatpush1.bf16.msra.mxu0 %v1697_v20  ;;  %874 = vmatpush1.bf16.msra.mxu1 %v1703_v22 }
 0x355   :  { %834 = vmatprep.subr.bf16.mxu0 %v1700_v21  ;;  %875 = vmatprep.subr.bf16.mxu1 %v1705_v23 }
 0x358   :  { %835 = vmatpush1.bf16.msra.mxu0 %v1709_v24  ;;  %876 = vmatpush1.bf16.msra.mxu1 %v1713_v25 }
 0x359   :  { %934 = vmatprep.subr.bf16.mxu0 %v1621_v58  ;;  %975 = vmatprep.subr.bf16.mxu1 %v1628_v61 }
 0x40e   :  { %v740_v49 = vpop.f32.mrb[12].mxu0  ;;  %v781_v50 = vpop.f32.mrb[12].mxu1 }
 0x40f   :  { %v788_v51 = vadd.f32 %v740_v49, %v702_v46  ;;  %v742_v53 = vpop.f32.mrb[13].mxu0  ;;  %v783_v54 = vpop.f32.mrb[13].mxu1  ;;  %v790_v32 = vadd.f32 %v781_v50, %v704_v52 }
 0x410   :  { %v789_v55 = vadd.f32 %v742_v53, %v703_v48  ;;  %v744_v56 = vpop.f32.mrb[14].mxu0  ;;  %v785_v27 = vpop.f32.mrb[14].mxu1  ;;  %v791_v35 = vadd.f32 %v783_v54, %v705_v34  ;;  %v1305_v53 = vld [vmem:[%s2021_s0 + $0x48] sm:$0xff] }
 0x411   :  { %v792_v28 = vmul.f32 0.5, %v788_v51  ;;  %v745_v29 = vpop.f32.mrb[15].mxu0  ;;  %v786_v30 = vpop.f32.mrb[15].mxu1 }
 0x412   :  { %v796_v31 = vmul.f32 0.5, %v789_v55  ;;  %v801_v36 = vmul.f32 0.5, %v791_v35 }
 0x413   :  { %1349 = vtanh.f32 %v792_v28  ;;  %v818_v28 = vunpack.c.l.bf16 %v1305_v53 }
 0x414   :  { %1351 = vtanh.f32 %v796_v31 }
 0x415   :  { %1353 = vtanh.f32 %v790_v32 }
 0x416   :  { %1355 = vtanh.f32 %v801_v36 }
 0x41d   :  { %v1350_v37 = vpop.eup %1349 }
 0x41e   :  { %v1352_v38 = vpop.eup %1351  ;;  %v794_v39 = vadd.f32 1.0, %v1350_v37 }
 0x41f   :  { %v798_v40 = vadd.f32 1.0, %v1352_v38  ;;  %v1354_v42 = vpop.eup %1353 }
 0x420   :  { %v795_v41 = vmul.f32 0.5, %v794_v39  ;;  %v1356_v46 = vpop.eup %1355 }
 0x421   :  { %v799_v43 = vmul.f32 0.5, %v798_v40  ;;  %v803_v47 = vadd.f32 1.0, %v1356_v46  ;;  %v819_v40 = vunpack.c.h.bf16 %v1305_v53 }
 0x422   :  { %v806_v44 = vmul.f32 %v1354_v42, %v795_v41 }
 0x423   :  { %v805_v45 = vmul.f32 %v799_v43, %v1853_v26  ;;  %v804_v48 = vmul.f32 0.5, %v803_v47  ;;  %v1304_v26 = vld [vmem:[%s2021_s0 + $0x40] sm:$0xff] }
 0x424   :  { %v816_v52 = vunpack.c.l.bf16 %v1304_v26  ;;  %v817_v54 = vunpack.c.h.bf16 %v1304_v26 }
 0x425   :  { %v1900_v33 = vadd.f32 %v806_v44, %v805_v45 }
 0x427   :  { %1357 = vtanh.f32 %v1900_v33 }
 0x431   :  { %v1358_v49 = vpop.eup %1357 }
 0x432   :  { %v809_v50 = vmul.f32 %v1358_v49, %v804_v48 }
 0x434   :  { %v810_v51 = vpack.c.bf16 %v809_v50, %v809_v50 }
 0x436   :  { %1303 = vst [vmem:[%s2023_s2 + $0xc] sm:$0xf] %v810_v51  ;;  %853 = vmatmul.mubr.bf16.vlgmr.msra.gmra.mrb[16].mxu0 %v810_v51  ;;  %894 = vmatmul.mubr.bf16.vlgmr.msra.gmra.mrb[16].mxu1 %v810_v51 }
 0x437   :  { %935 = vmatpush1.bf16.msra.mxu0 %v1623_v59  ;;  %976 = vmatpush1.bf16.msra.mxu1 %v1630_v62 }
 0x438   :  { %936 = vmatprep.subr.bf16.mxu0 %v1625_v60  ;;  %977 = vmatprep.subr.bf16.mxu1 %v1634_v63 }
 0x439   :  { %966 = vmatprep.mubr.bf16.mxu0 %v1431_v57  ;;  %1007 = vmatprep.mubr.bf16.mxu1 %v1431_v57 }
 0x43b   :  { %937 = vmatpush1.bf16.msra.mxu0 %v1637_v0  ;;  %978 = vmatpush1.bf16.msra.mxu1 %v1643_v2 }
 0x43c   :  { %938 = vmatprep.subr.bf16.mxu0 %v1640_v1  ;;  %979 = vmatprep.subr.bf16.mxu1 %v1645_v3 }
 0x43f   :  { %939 = vmatpush1.bf16.msra.mxu0 %v1649_v4  ;;  %980 = vmatpush1.bf16.msra.mxu1 %v1655_v6 }
 0x440   :  { %940 = vmatprep.subr.bf16.mxu0 %v1652_v5  ;;  %981 = vmatprep.subr.bf16.mxu1 %v1657_v7 }
 0x443   :  { %941 = vmatpush1.bf16.msra.mxu0 %v1661_v8  ;;  %982 = vmatpush1.bf16.msra.mxu1 %v1667_v10 }
 0x444   :  { %942 = vmatprep.subr.bf16.mxu0 %v1664_v9  ;;  %983 = vmatprep.subr.bf16.mxu1 %v1669_v11 }
 0x447   :  { %943 = vmatpush1.bf16.msra.mxu0 %v1673_v12  ;;  %984 = vmatpush1.bf16.msra.mxu1 %v1679_v14 }
 0x448   :  { %944 = vmatprep.subr.bf16.mxu0 %v1676_v13  ;;  %985 = vmatprep.subr.bf16.mxu1 %v1681_v15 }
 0x44b   :  { %945 = vmatpush1.bf16.msra.mxu0 %v1685_v16  ;;  %986 = vmatpush1.bf16.msra.mxu1 %v1691_v18 }
 0x44c   :  { %946 = vmatprep.subr.bf16.mxu0 %v1688_v17  ;;  %987 = vmatprep.subr.bf16.mxu1 %v1693_v19 }
 0x44f   :  { %947 = vmatpush1.bf16.msra.mxu0 %v1697_v20  ;;  %988 = vmatpush1.bf16.msra.mxu1 %v1703_v22 }
 0x450   :  { %948 = vmatprep.subr.bf16.mxu0 %v1700_v21  ;;  %989 = vmatprep.subr.bf16.mxu1 %v1705_v23 }
 0x453   :  { %949 = vmatpush1.bf16.msra.mxu0 %v1709_v24  ;;  %990 = vmatpush1.bf16.msra.mxu1 %v1713_v25 }
 0x454   :  { %1048 = vmatprep.subr.bf16.mxu0 %v1621_v58  ;;  %1089 = vmatprep.subr.bf16.mxu1 %v1628_v61 }
 0x509   :  { %v854_v55 = vpop.f32.mrb[16].mxu0  ;;  %v895_v56 = vpop.f32.mrb[16].mxu1 }
 0x50a   :  { %v902_v27 = vadd.f32 %v854_v55, %v816_v52  ;;  %v856_v29 = vpop.f32.mrb[17].mxu0  ;;  %v897_v30 = vpop.f32.mrb[17].mxu1  ;;  %v904_v39 = vadd.f32 %v895_v56, %v818_v28 }
 0x50b   :  { %v903_v31 = vadd.f32 %v856_v29, %v817_v54  ;;  %v858_v32 = vpop.f32.mrb[18].mxu0  ;;  %v899_v34 = vpop.f32.mrb[18].mxu1  ;;  %v905_v41 = vadd.f32 %v897_v30, %v819_v40  ;;  %v1406_v40 = vld [vmem:[#allocation2 + $0x58] sm:$0xff] }
 0x50c   :  { %v906_v35 = vmul.f32 0.5, %v902_v27  ;;  %v859_v36 = vpop.f32.mrb[19].mxu0  ;;  %v900_v37 = vpop.f32.mrb[19].mxu1  ;;  %v1399_v32 = vld [vmem:[#allocation2] sm:$0xff]  ;;  %v1400_v34 = vld [vmem:[#allocation2 + $0x10] sm:$0xff] }
 0x50d   :  { %v910_v38 = vmul.f32 0.5, %v903_v31  ;;  %v915_v42 = vmul.f32 0.5, %v905_v41  ;;  %v1402_v36 = vld [vmem:[#allocation2 + $0x38] sm:$0xff]  ;;  %v1403_v37 = vld [vmem:[#allocation2 + $0x20] sm:$0xff] }
 0x50e   :  { %1359 = vtanh.f32 %v906_v35  ;;  %v1401_v35 = vld [vmem:[#allocation2 + $0x28] sm:$0xff]  ;;  %v1407_v41 = vld [vmem:[#allocation2 + $0x40] sm:$0xff] }
 0x50f   :  { %1361 = vtanh.f32 %v910_v38  ;;  %v1404_v38 = vld [vmem:[#allocation2 + $0x30] sm:$0xff] }
 0x510   :  { %1363 = vtanh.f32 %v904_v39  ;;  %v1405_v39 = vld [vmem:[#allocation2 + $0x48] sm:$0xff] }
 0x511   :  { %1365 = vtanh.f32 %v915_v42  ;;  %v1408_v42 = vld [vmem:[#allocation2 + $0x50] sm:$0xff] }
 0x518   :  { %v1360_v43 = vpop.eup %1359 }
 0x519   :  { %v1362_v44 = vpop.eup %1361  ;;  %v908_v45 = vadd.f32 1.0, %v1360_v43  ;;  %v1409_v43 = vld [vmem:[#allocation2 + $0x68] sm:$0xff] }
 0x51a   :  { %v912_v46 = vadd.f32 1.0, %v1362_v44  ;;  %v1364_v48 = vpop.eup %1363  ;;  %v1410_v44 = vld [vmem:[#allocation2 + $0x78] sm:$0xff] }
 0x51b   :  { %v909_v47 = vmul.f32 0.5, %v908_v45  ;;  %v1366_v52 = vpop.eup %1365  ;;  %v1411_v45 = vld [vmem:[#allocation2 + $0x60] sm:$0xff] }
 0x51c   :  { %v913_v49 = vmul.f32 0.5, %v912_v46  ;;  %v917_v53 = vadd.f32 1.0, %v1366_v52  ;;  %v1412_v46 = vld [vmem:[#allocation2 + $0x70] sm:$0xff] }
 0x51d   :  { %v920_v50 = vmul.f32 %v1364_v48, %v909_v47  ;;  %v1414_v47 = vld [vmem:[#allocation2 + $0x98] sm:$0xff]  ;;  %v1415_v48 = vld [vmem:[#allocation2 + $0x80] sm:$0xff]  ;;  %v1420_v52 = vld [vmem:[#allocation2 + $0xb0] sm:$0xff] }
 0x51e   :  { %v919_v51 = vmul.f32 %v913_v49, %v1900_v33  ;;  %v918_v54 = vmul.f32 0.5, %v917_v53  ;;  %v1416_v49 = vld [vmem:[#allocation2 + $0x90] sm:$0xff]  ;;  %v1421_v53 = vld [vmem:[#allocation2 + $0xc8] sm:$0xff] }
 0x520   :  { %v1947_v26 = vadd.f32 %v920_v50, %v919_v51  ;;  %v1417_v50 = vld [vmem:[#allocation2 + $0xa8] sm:$0xff]  ;;  %v1418_v51 = vld [vmem:[#allocation2 + $0xb8] sm:$0xff] }
 0x522   :  { %1367 = vtanh.f32 %v1947_v26 }
 0x52c   :  { %v1368_v55 = vpop.eup %1367 }
 0x52d   :  { %v923_v56 = vmul.f32 %v1368_v55, %v918_v54  ;;  %v1422_v54 = vld [vmem:[#allocation2 + $0xd8] sm:$0xff]  ;;  %v1423_v55 = vld [vmem:[#allocation2 + $0xc0] sm:$0xff] }
 0x52f   :  { %v924_v27 = vpack.c.bf16 %v923_v56, %v923_v56  ;;  %v1424_v56 = vld [vmem:[#allocation2 + $0xd0] sm:$0xff] }
 0x531   :  { %1306 = vst [vmem:[%s2023_s2 + $0x10] sm:$0xf] %v924_v27  ;;  %967 = vmatmul.mubr.bf16.vlgmr.msra.gmra.mrb[20].mxu0 %v924_v27  ;;  %1008 = vmatmul.mubr.bf16.vlgmr.msra.gmra.mrb[20].mxu1 %v924_v27  ;;  %v1425_v27 = vld [vmem:[#allocation2 + $0xe8] sm:$0xff] }
 0x532   :  { %1049 = vmatpush1.bf16.msra.mxu0 %v1623_v59  ;;  %1090 = vmatpush1.bf16.msra.mxu1 %v1630_v62  ;;  %v1307_v59 = vld [vmem:[%s2021_s0 + $0x50] sm:$0xff]  ;;  %v1308_v62 = vld [vmem:[%s2021_s0 + $0x58] sm:$0xff] }
 0x533   :  { %1050 = vmatprep.subr.bf16.mxu0 %v1625_v60  ;;  %1091 = vmatprep.subr.bf16.mxu1 %v1634_v63  ;;  %v930_v60 = vunpack.c.l.bf16 %v1307_v59  ;;  %v931_v63 = vunpack.c.h.bf16 %v1307_v59  ;;  %v1426_v59 = vld [vmem:[#allocation2 + $0xf8] sm:$0xff] }
 0x534   :  { %1080 = vmatprep.mubr.bf16.mxu0 %v1431_v57  ;;  %1121 = vmatprep.mubr.bf16.mxu1 %v1431_v57 }
 0x536   :  { %1051 = vmatpush1.bf16.msra.mxu0 %v1637_v0  ;;  %1092 = vmatpush1.bf16.msra.mxu1 %v1643_v2 }
 0x537   :  { %1052 = vmatprep.subr.bf16.mxu0 %v1640_v1  ;;  %1093 = vmatprep.subr.bf16.mxu1 %v1645_v3  ;;  %v932_v3 = vunpack.c.l.bf16 %v1308_v62 }
 0x53a   :  { %1053 = vmatpush1.bf16.msra.mxu0 %v1649_v4  ;;  %1094 = vmatpush1.bf16.msra.mxu1 %v1655_v6 }
 0x53b   :  { %1054 = vmatprep.subr.bf16.mxu0 %v1652_v5  ;;  %1095 = vmatprep.subr.bf16.mxu1 %v1657_v7 }
 0x53e   :  { %1055 = vmatpush1.bf16.msra.mxu0 %v1661_v8  ;;  %1096 = vmatpush1.bf16.msra.mxu1 %v1667_v10 }
 0x53f   :  { %1056 = vmatprep.subr.bf16.mxu0 %v1664_v9  ;;  %1097 = vmatprep.subr.bf16.mxu1 %v1669_v11 }
 0x542   :  { %1057 = vmatpush1.bf16.msra.mxu0 %v1673_v12  ;;  %1098 = vmatpush1.bf16.msra.mxu1 %v1679_v14  ;;  %v933_v12 = vunpack.c.h.bf16 %v1308_v62  ;;  %v1428_v62 = vld [vmem:[#allocation2 + $0xf0] sm:$0xff] }
 0x543   :  { %1058 = vmatprep.subr.bf16.mxu0 %v1676_v13  ;;  %1099 = vmatprep.subr.bf16.mxu1 %v1681_v15 }
 0x546   :  { %1059 = vmatpush1.bf16.msra.mxu0 %v1685_v16  ;;  %1100 = vmatpush1.bf16.msra.mxu1 %v1691_v18 }
 0x547   :  { %1060 = vmatprep.subr.bf16.mxu0 %v1688_v17  ;;  %1101 = vmatprep.subr.bf16.mxu1 %v1693_v19 }
 0x54a   :  { %1061 = vmatpush1.bf16.msra.mxu0 %v1697_v20  ;;  %1102 = vmatpush1.bf16.msra.mxu1 %v1703_v22 }
 0x54b   :  { %1062 = vmatprep.subr.bf16.mxu0 %v1700_v21  ;;  %1103 = vmatprep.subr.bf16.mxu1 %v1705_v23 }
 0x54e   :  { %1063 = vmatpush1.bf16.msra.mxu0 %v1709_v24  ;;  %1104 = vmatpush1.bf16.msra.mxu1 %v1713_v25 }
 0x54f   :  { %1162 = vmatprep.subr.bf16.mxu0 %v1621_v58  ;;  %1203 = vmatprep.subr.bf16.mxu1 %v1628_v61 }
 0x604   :  { %v968_v0 = vpop.f32.mrb[20].mxu0  ;;  %v1009_v1 = vpop.f32.mrb[20].mxu1 }
 0x605   :  { %v1016_v2 = vadd.f32 %v968_v0, %v930_v60  ;;  %v970_v4 = vpop.f32.mrb[21].mxu0  ;;  %v1011_v5 = vpop.f32.mrb[21].mxu1  ;;  %v1018_v11 = vadd.f32 %v1009_v1, %v932_v3  ;;  %v1427_v60 = vld [vmem:[#allocation2 + $0xe0] sm:$0xff]  ;;  %v1311_v1 = vld [vmem:[%s2021_s0 + $0x68] sm:$0xff] }
 0x606   :  { %v1017_v6 = vadd.f32 %v970_v4, %v931_v63  ;;  %v972_v58 = vpop.f32.mrb[22].mxu0  ;;  %v1013_v7 = vpop.f32.mrb[22].mxu1  ;;  %v1019_v13 = vadd.f32 %v1011_v5, %v933_v12  ;;  %v1310_v63 = vld [vmem:[%s2021_s0 + $0x60] sm:$0xff] }
 0x607   :  { %v1020_v61 = vmul.f32 0.5, %v1016_v2  ;;  %v973_v8 = vpop.f32.mrb[23].mxu0  ;;  %v1014_v9 = vpop.f32.mrb[23].mxu1  ;;  %v1044_v0 = vunpack.c.l.bf16 %v1310_v63  ;;  %v1045_v2 = vunpack.c.h.bf16 %v1310_v63 }
 0x608   :  { %v1024_v10 = vmul.f32 0.5, %v1017_v6  ;;  %v1029_v14 = vmul.f32 0.5, %v1019_v13  ;;  %v1046_v6 = vunpack.c.l.bf16 %v1311_v1 }
 0x609   :  { %1369 = vtanh.f32 %v1020_v61 }
 0x60a   :  { %1371 = vtanh.f32 %v1024_v10 }
 0x60b   :  { %1373 = vtanh.f32 %v1018_v11 }
 0x60c   :  { %1375 = vtanh.f32 %v1029_v14 }
 0x613   :  { %v1370_v15 = vpop.eup %1369 }
 0x614   :  { %v1372_v16 = vpop.eup %1371  ;;  %v1022_v17 = vadd.f32 1.0, %v1370_v15  ;;  %v1047_v15 = vunpack.c.h.bf16 %v1311_v1 }
 0x615   :  { %v1026_v18 = vadd.f32 1.0, %v1372_v16  ;;  %v1374_v20 = vpop.eup %1373 }
 0x616   :  { %v1023_v19 = vmul.f32 0.5, %v1022_v17  ;;  %v1376_v25 = vpop.eup %1375 }
 0x617   :  { %v1027_v21 = vmul.f32 0.5, %v1026_v18  ;;  %v1031_v33 = vadd.f32 1.0, %v1376_v25 }
 0x618   :  { %v1034_v22 = vmul.f32 %v1374_v20, %v1023_v19 }
 0x619   :  { %v1033_v23 = vmul.f32 %v1027_v21, %v1947_v26  ;;  %v1032_v28 = vmul.f32 0.5, %v1031_v33  ;;  %v1419_v26 = vld [vmem:[#allocation2 + $0xa0] sm:$0xff] }
 0x61b   :  { %v1994_v24 = vadd.f32 %v1034_v22, %v1033_v23 }
 0x61d   :  { %1377 = vtanh.f32 %v1994_v24 }
 0x627   :  { %v1378_v29 = vpop.eup %1377 }
 0x628   :  { %v1037_v30 = vmul.f32 %v1378_v29, %v1032_v28 }
 0x62a   :  { %v1038_v31 = vpack.c.bf16 %v1037_v30, %v1037_v30 }
 0x62c   :  { %1309 = vst [vmem:[%s2023_s2 + $0x14] sm:$0xf] %v1038_v31  ;;  %1081 = vmatmul.mubr.bf16.vlgmr.msra.gmra.mrb[24].mxu0 %v1038_v31  ;;  %1122 = vmatmul.mubr.bf16.vlgmr.msra.gmra.mrb[24].mxu1 %v1038_v31 }
 0x62d   :  { %1163 = vmatpush1.bf16.msra.mxu0 %v1399_v32  ;;  %1204 = vmatpush1.bf16.msra.mxu1 %v1400_v34 }
 0x62e   :  { %1164 = vmatprep.subr.bf16.mxu0 %v1401_v35  ;;  %1205 = vmatprep.subr.bf16.mxu1 %v1402_v36 }
 0x62f   :  { %1194 = vmatprep.mubr.bf16.mxu0 %v1431_v57  ;;  %1235 = vmatprep.mubr.bf16.mxu1 %v1431_v57  ;;  %v1413_v57 = vld [vmem:[#allocation2 + $0x88] sm:$0xff] }
 0x631   :  { %1165 = vmatpush1.bf16.msra.mxu0 %v1403_v37  ;;  %1206 = vmatpush1.bf16.msra.mxu1 %v1404_v38  ;;  %v1313_v37 = vld [vmem:[%s2021_s0 + $0x70] sm:$0xff] }
 0x632   :  { %1166 = vmatprep.subr.bf16.mxu0 %v1405_v39  ;;  %1207 = vmatprep.subr.bf16.mxu1 %v1406_v40  ;;  %v1158_v38 = vunpack.c.l.bf16 %v1313_v37  ;;  %v1159_v39 = vunpack.c.h.bf16 %v1313_v37 }
 0x635   :  { %1167 = vmatpush1.bf16.msra.mxu0 %v1407_v41  ;;  %1208 = vmatpush1.bf16.msra.mxu1 %v1408_v42 }
 0x636   :  { %1168 = vmatprep.subr.bf16.mxu0 %v1409_v43  ;;  %1209 = vmatprep.subr.bf16.mxu1 %v1410_v44 }
 0x639   :  { %1169 = vmatpush1.bf16.msra.mxu0 %v1411_v45  ;;  %1210 = vmatpush1.bf16.msra.mxu1 %v1412_v46 }
 0x63a   :  { %1170 = vmatprep.subr.bf16.mxu0 %v1413_v57  ;;  %1211 = vmatprep.subr.bf16.mxu1 %v1414_v47 }
 0x63d   :  { %1171 = vmatpush1.bf16.msra.mxu0 %v1415_v48  ;;  %1212 = vmatpush1.bf16.msra.mxu1 %v1416_v49 }
 0x63e   :  { %1172 = vmatprep.subr.bf16.mxu0 %v1417_v50  ;;  %1213 = vmatprep.subr.bf16.mxu1 %v1418_v51 }
 0x641   :  { %1173 = vmatpush1.bf16.msra.mxu0 %v1419_v26  ;;  %1214 = vmatpush1.bf16.msra.mxu1 %v1420_v52 }
 0x642   :  { %1174 = vmatprep.subr.bf16.mxu0 %v1421_v53  ;;  %1215 = vmatprep.subr.bf16.mxu1 %v1422_v54 }
 0x645   :  { %1175 = vmatpush1.bf16.msra.mxu0 %v1423_v55  ;;  %1216 = vmatpush1.bf16.msra.mxu1 %v1424_v56 }
 0x646   :  { %1176 = vmatprep.subr.bf16.mxu0 %v1425_v27  ;;  %1217 = vmatprep.subr.bf16.mxu1 %v1426_v59 }
 0x649   :  { %1177 = vmatpush1.bf16.msra.mxu0 %v1427_v60  ;;  %1218 = vmatpush1.bf16.msra.mxu1 %v1428_v62 }
 0x6ff   :  { %v1082_v3 = vpop.f32.mrb[24].mxu0  ;;  %v1123_v4 = vpop.f32.mrb[24].mxu1 }
 0x700   :  { %v1130_v5 = vadd.f32 %v1082_v3, %v1044_v0  ;;  %v1084_v58 = vpop.f32.mrb[25].mxu0  ;;  %v1125_v7 = vpop.f32.mrb[25].mxu1  ;;  %v1132_v14 = vadd.f32 %v1123_v4, %v1046_v6 }
 0x701   :  { %v1131_v61 = vadd.f32 %v1084_v58, %v1045_v2  ;;  %v1086_v8 = vpop.f32.mrb[26].mxu0  ;;  %v1127_v9 = vpop.f32.mrb[26].mxu1  ;;  %v1133_v16 = vadd.f32 %v1125_v7, %v1047_v15 }
 0x702   :  { %v1134_v10 = vmul.f32 0.5, %v1130_v5  ;;  %v1087_v11 = vpop.f32.mrb[27].mxu0  ;;  %v1128_v12 = vpop.f32.mrb[27].mxu1 }
 0x703   :  { %v1138_v13 = vmul.f32 0.5, %v1131_v61  ;;  %v1143_v17 = vmul.f32 0.5, %v1133_v16 }
 0x704   :  { %1379 = vtanh.f32 %v1134_v10 }
 0x705   :  { %1381 = vtanh.f32 %v1138_v13 }
 0x706   :  { %1383 = vtanh.f32 %v1132_v14 }
 0x707   :  { %1385 = vtanh.f32 %v1143_v17 }
 0x70e   :  { %v1380_v18 = vpop.eup %1379 }
 0x70f   :  { %v1382_v19 = vpop.eup %1381  ;;  %v1136_v20 = vadd.f32 1.0, %v1380_v18 }
 0x710   :  { %v1140_v21 = vadd.f32 1.0, %v1382_v19  ;;  %v1384_v23 = vpop.eup %1383 }
 0x711   :  { %v1137_v22 = vmul.f32 0.5, %v1136_v20  ;;  %v1386_v30 = vpop.eup %1385 }
 0x712   :  { %v1141_v25 = vmul.f32 0.5, %v1140_v21  ;;  %v1145_v31 = vadd.f32 1.0, %v1386_v30 }
 0x713   :  { %v1148_v33 = vmul.f32 %v1384_v23, %v1137_v22 }
 0x714   :  { %v1147_v28 = vmul.f32 %v1141_v25, %v1994_v24  ;;  %v1146_v32 = vmul.f32 0.5, %v1145_v31  ;;  %v1314_v24 = vld [vmem:[%s2021_s0 + $0x78] sm:$0xff] }
 0x715   :  { %v1160_v43 = vunpack.c.l.bf16 %v1314_v24  ;;  %v1161_v52 = vunpack.c.h.bf16 %v1314_v24 }
 0x716   :  { %v1149_v29 = vadd.f32 %v1148_v33, %v1147_v28 }
 0x718   :  { %1387 = vtanh.f32 %v1149_v29 }
 0x722   :  { %v1388_v34 = vpop.eup %1387 }
 0x723   :  { %v1151_v35 = vmul.f32 %v1388_v34, %v1146_v32 }
 0x725   :  { %v1152_v36 = vpack.c.bf16 %v1151_v35, %v1151_v35 }
 0x727   :  { %1312 = vst [vmem:[%s2023_s2 + $0x18] sm:$0xf] %v1152_v36  ;;  %1195 = vmatmul.mubr.bf16.vlgmr.msra.gmra.mrb[28].mxu0 %v1152_v36  ;;  %1236 = vmatmul.mubr.bf16.vlgmr.msra.gmra.mrb[28].mxu1 %v1152_v36 }
 0x7fa   :  { %v1196_v40 = vpop.f32.mrb[28].mxu0  ;;  %v1237_v41 = vpop.f32.mrb[28].mxu1 }
 0x7fb   :  { %v1244_v42 = vadd.f32 %v1196_v40, %v1158_v38  ;;  %v1198_v44 = vpop.f32.mrb[29].mxu0  ;;  %v1239_v45 = vpop.f32.mrb[29].mxu1  ;;  %v1246_v26 = vadd.f32 %v1237_v41, %v1160_v43 }
 0x7fc   :  { %v1245_v46 = vadd.f32 %v1198_v44, %v1159_v39  ;;  %v1200_v57 = vpop.f32.mrb[30].mxu0  ;;  %v1241_v47 = vpop.f32.mrb[30].mxu1  ;;  %v1247_v53 = vadd.f32 %v1239_v45, %v1161_v52 }
 0x7fd   :  { %v1248_v48 = vmul.f32 0.5, %v1244_v42  ;;  %v1201_v49 = vpop.f32.mrb[31].mxu0  ;;  %v1242_v50 = vpop.f32.mrb[31].mxu1 }
 0x7fe   :  { %v1252_v51 = vmul.f32 0.5, %v1245_v46  ;;  %v1257_v54 = vmul.f32 0.5, %v1247_v53 }
 0x7ff   :  { %1389 = vtanh.f32 %v1248_v48 }
 0x800   :  { %1391 = vtanh.f32 %v1252_v51 }
 0x801   :  { %1393 = vtanh.f32 %v1246_v26 }
 0x802   :  { %1395 = vtanh.f32 %v1257_v54 }
 0x809   :  { %v1390_v55 = vpop.eup %1389 }
 0x80a   :  { %v1392_v56 = vpop.eup %1391  ;;  %v1250_v27 = vadd.f32 1.0, %v1390_v55 }
 0x80b   :  { %v1254_v59 = vadd.f32 1.0, %v1392_v56  ;;  %v1394_v62 = vpop.eup %1393 }
 0x80c   :  { %v1251_v60 = vmul.f32 0.5, %v1250_v27  ;;  %v1396_v3 = vpop.eup %1395 }
 0x80d   :  { %v1255_v63 = vmul.f32 0.5, %v1254_v59  ;;  %v1259_v4 = vadd.f32 1.0, %v1396_v3 }
 0x80e   :  { %v1262_v0 = vmul.f32 %v1394_v62, %v1251_v60 }
 0x80f   :  { %v1261_v1 = vmul.f32 %v1255_v63, %v1149_v29  ;;  %v1260_v5 = vmul.f32 0.5, %v1259_v4 }
 0x811   :  { %v1263_v2 = vadd.f32 %v1262_v0, %v1261_v1 }
 0x813   :  { %1397 = vtanh.f32 %v1263_v2 }
 0x81d   :  { %v1398_v6 = vpop.eup %1397 }
 0x81e   :  { %v1265_v58 = vmul.f32 %v1398_v6, %v1260_v5 }
 0x820   :  { %v1266_v7 = vpack.c.bf16 %v1265_v58, %v1265_v58 }
 0x822   :  { %1315 = vst [vmem:[%s2023_s2 + $0x1c] sm:$0xf] %v1266_v7 }
 0x823   :  { %1275 = vsyncmov [#allocation3] }
 0x826   :  { %s1276_s28 = vpop.sfrf %1275 }
 0x827   :  { %p1316_p0 = scmp.ne.s32.totalorder %s1276_s28, 0 }
 0x829   :  { %1280 = shalt.err (%p1316_p0)  }

</bundles_post_ra>
